<compile_context>
chip_gen: v7x
topology: tpu7x:2x2x1
jax: 0.10.0
libtpu: 0.0.40
codegen_flags: <defaults>
</compile_context>

<pallas_src>
import functools

import jax
import jax.numpy as jnp
from jax import lax
from jax.experimental import pallas as pl
from jax.experimental.pallas import tpu as pltpu


# ---------------------------------------------------------------------------
# Kernels
# ---------------------------------------------------------------------------

def _stats_kernel(x_ref, mask_ref, sr_ref, sa_ref, qr_ref, qa_ref):
    """Per-row partial sums over the lane (M) axis.

    x_ref:    (Rt, Mt) block, real on even lanes / imag on odd lanes.
    mask_ref: (1, Mt) f32, 1.0 on real lanes, 0.0 on imag lanes (resident).
    sr/sa/qr/qa: (1, Rt, 1) f32 accumulators, resident across the reduction
                 (last) grid axis:
                 sr=sum(real), sa=sum(all), qr=sum(real^2), qa=sum(all^2).
    """
    @pl.when(pl.program_id(2) == 0)
    def _init():
        sr_ref[...] = jnp.zeros_like(sr_ref)
        sa_ref[...] = jnp.zeros_like(sa_ref)
        qr_ref[...] = jnp.zeros_like(qr_ref)
        qa_ref[...] = jnp.zeros_like(qa_ref)

    x = x_ref[...].astype(jnp.float32)          # (Rt, Mt)
    mr = mask_ref[...]                          # (1, Mt), broadcasts over rows
    xr = x * mr
    x2 = x * x
    x2r = x2 * mr
    sr_ref[0] += jnp.sum(xr, axis=-1, keepdims=True)
    sa_ref[0] += jnp.sum(x, axis=-1, keepdims=True)
    qr_ref[0] += jnp.sum(x2r, axis=-1, keepdims=True)
    qa_ref[0] += jnp.sum(x2, axis=-1, keepdims=True)


def _norm_kernel(x_ref, mask_ref, scale_ref, shift_ref, o_ref):
    """y = x * scale + shift with scale/shift picked per row and lane parity.

    x_ref/o_ref: (Rt, Mt);  mask_ref: (1, Mt) f32 (resident);
    scale_ref/shift_ref: (Rt, 2) f32 (col 0 = real, col 1 = imag).
    """
    x = x_ref[...].astype(jnp.float32)
    shape = x.shape
    is_real = jnp.broadcast_to(mask_ref[...], shape) > 0.5
    scale = jnp.where(is_real,
                      jnp.broadcast_to(scale_ref[:, 0:1], shape),
                      jnp.broadcast_to(scale_ref[:, 1:2], shape))
    shift = jnp.where(is_real,
                      jnp.broadcast_to(shift_ref[:, 0:1], shape),
                      jnp.broadcast_to(shift_ref[:, 1:2], shape))
    o_ref[...] = (x * scale + shift).astype(o_ref.dtype)


# ---------------------------------------------------------------------------
# Tiling helpers (generation-aware)
# ---------------------------------------------------------------------------

def _round_up(a, b):
    return (a + b - 1) // b * b


def _vmem_capacity_bytes():
    try:
        cap = getattr(pltpu.get_tpu_info(), "vmem_capacity_bytes", None)
        if cap:
            return int(cap)
    except Exception:
        pass
    return 64 * 1024 * 1024  # conservative (v7x-sized) fallback


def _pick_lane_tile(M, max_lanes):
    """Multiple-of-128 lane tile Mt and padded extent M_p (Mt divides M_p)."""
    max_lanes = max(128, (max_lanes // 128) * 128)
    if M <= max_lanes:
        mt = _round_up(M, 128)
        return mt, mt
    best = None
    t = 128
    while t <= max_lanes:                     # prefer exact divisor -> no pad copy
        if M % t == 0:
            best = t
        t += 128
    if best is not None and best >= max_lanes // 4:
        return best, M
    return max_lanes, _round_up(M, max_lanes)


def _pick_row_tile(R, max_rows):
    """Row tile Rt (multiple of 8, or == padded extent) and padded extent."""
    if R <= max_rows:
        return R, R                           # full-dim block is always legal
    best = None
    t = 8
    while t <= max_rows:
        if R % t == 0:
            best = t
        t += 8
    if best is not None and best >= max(8, max_rows // 4):
        return best, R
    max_rows = max(8, (max_rows // 8) * 8)
    return max_rows, _round_up(R, max_rows)


# ---------------------------------------------------------------------------
# Wrapper
# ---------------------------------------------------------------------------

@functools.partial(jax.jit, static_argnames=("eps",))
def cbatchnorm2d(x, gamma_r, beta_r, gamma_i, beta_i, eps=1e-5):
    """x: (N, C, H, W, 2); gamma_*/beta_*: (C,). Returns (N, C, H, W, 2)."""
    N, C, H, W, two = x.shape
    assert two == 2, "last dimension must hold [real, imag]"
    R = N * C
    M = H * W * 2
    x_flat = x.reshape(R, M)                  # free: contiguous collapse

    # ---- generation-aware tile sizing ------------------------------------
    vmem_cap = _vmem_capacity_bytes()
    buf_budget = max(512 * 1024, min(vmem_cap // 16, 8 * 1024 * 1024))
    elems = buf_budget // 4                   # f32 elements per buffer
    Mt, M_p = _pick_lane_tile(M, min(elems // 8, 64 * 1024))
    Rt, R_pad = _pick_row_tile(R, max(8, elems // Mt))
    if (R_pad, M_p) != (R, M):
        x_flat = jnp.pad(x_flat, ((0, R_pad - R), (0, M_p - M)))

    r_blocks = R_pad // Rt
    m_blocks = M_p // Mt
    # Second parallel axis so v7x megacore has work when there is 1 row block.
    G = 2 if (r_blocks == 1 and m_blocks >= 2 and m_blocks % 2 == 0) else 1
    m_per_g = m_blocks // G

    vmem_limit = int(min(vmem_cap // 2, 64 * 1024 * 1024))
    cparams_stats = pltpu.CompilerParams(
        dimension_semantics=("parallel", "parallel", "arbitrary"),
        vmem_limit_bytes=vmem_limit)
    cparams_norm = pltpu.CompilerParams(
        dimension_semantics=("parallel", "parallel"),
        vmem_limit_bytes=vmem_limit)

    # Lane-parity mask, DMA'd once (resident): 1.0 on real lanes, 0.0 on imag.
    mask = jnp.tile(jnp.array([1.0, 0.0], dtype=jnp.float32),
                    Mt // 2).reshape(1, Mt)

    # ---- Phase 1: per-row partial sums -----------------------------------
    stat_shape = jax.ShapeDtypeStruct((G, R_pad, 1), jnp.float32)
    stat_spec = pl.BlockSpec((1, Rt, 1), lambda r, g, m: (g, r, 0))
    p_sr, p_sa, p_qr, p_qa = pl.pallas_call(
        _stats_kernel,
        out_shape=(stat_shape, stat_shape, stat_shape, stat_shape),
        grid_spec=pltpu.PrefetchScalarGridSpec(
            num_scalar_prefetch=0,
            grid=(r_blocks, G, m_per_g),
            in_specs=[
                pl.BlockSpec((Rt, Mt), lambda r, g, m: (r, g * m_per_g + m)),
                pl.BlockSpec((1, Mt), lambda r, g, m: (0, 0)),
            ],
            out_specs=[stat_spec, stat_spec, stat_spec, stat_spec],
        ),
        compiler_params=cparams_stats,
    )(x_flat, mask)

    # ---- Tiny JAX epilogue: means / vars / fused per-row scale & shift ----
    def _per_channel(p):                      # (G, R_pad, 1) -> (C,)
        return p[:, :R, 0].reshape(G * N, C).sum(axis=0)

    cnt = jnp.float32(N * H * W)
    s_r = _per_channel(p_sr)
    s_a = _per_channel(p_sa)
    q_r = _per_channel(p_qr)
    q_a = _per_channel(p_qa)
    s_i = s_a - s_r
    q_i = q_a - q_r

    mean = jnp.stack([s_r, s_i], axis=-1) / cnt                  # (C, 2)
    msq = jnp.stack([q_r, q_i], axis=-1) / cnt
    var = jnp.maximum(msq - mean * mean, 0.0)                    # biased, clamped
    inv = lax.rsqrt(var + jnp.float32(eps))
    gamma = jnp.stack([gamma_r, gamma_i], axis=-1).astype(jnp.float32)
    beta = jnp.stack([beta_r, beta_i], axis=-1).astype(jnp.float32)
    scale_c = inv * gamma                                        # (C, 2)
    shift_c = beta - mean * scale_c                              # (C, 2)

    scale_rows = jnp.tile(scale_c, (N, 1))                       # (R, 2) row n*C+c
    shift_rows = jnp.tile(shift_c, (N, 1))
    if R_pad != R:
        scale_rows = jnp.pad(scale_rows, ((0, R_pad - R), (0, 0)))
        shift_rows = jnp.pad(shift_rows, ((0, R_pad - R), (0, 0)))

    # ---- Phase 2: stream x again, fused y = x*scale + shift ---------------
    out_flat = pl.pallas_call(
        _norm_kernel,
        out_shape=jax.ShapeDtypeStruct((R_pad, M_p), x.dtype),
        grid_spec=pltpu.PrefetchScalarGridSpec(
            num_scalar_prefetch=0,
            grid=(r_blocks, m_blocks),
            in_specs=[
                pl.BlockSpec((Rt, Mt), lambda r, m: (r, m)),
                pl.BlockSpec((1, Mt), lambda r, m: (0, 0)),
                pl.BlockSpec((Rt, 2), lambda r, m: (r, 0)),
                pl.BlockSpec((Rt, 2), lambda r, m: (r, 0)),
            ],
            out_specs=pl.BlockSpec((Rt, Mt), lambda r, m: (r, m)),
        ),
        compiler_params=cparams_norm,
    )(x_flat, mask, scale_rows, shift_rows)

    if (R_pad, M_p) != (R, M):
        out_flat = out_flat[:R, :M]
    return out_flat.reshape(N, C, H, W, 2)    # free reshape


# ---------------------------------------------------------------------------
# Pure-JAX reference (training-mode BatchNorm2d on each part)
# ---------------------------------------------------------------------------

def cbatchnorm2d_ref(x, gamma_r, beta_r, gamma_i, beta_i, eps=1e-5):
    def bn(xp, g, b):
        mean = jnp.mean(xp, axis=(0, 2, 3), keepdims=True)
        var = jnp.mean((xp - mean) ** 2, axis=(0, 2, 3), keepdims=True)
        return ((xp - mean) / jnp.sqrt(var + eps) * g[None, :, None, None]
                + b[None, :, None, None])

    n_real = bn(x[..., 0], gamma_r, beta_r)
    n_im = bn(x[..., 1], gamma_i, beta_i)
    return jnp.stack([n_real, n_im], axis=-1)


if __name__ == "__main__":
    key = jax.random.PRNGKey(0)
    k_x, k_gr, k_br, k_gi, k_bi = jax.random.split(key, 5)

    N, C, H, W = 2, 4, 16, 16
    x = jax.random.normal(k_x, (N, C, H, W, 2), dtype=jnp.float32)

    # PyTorch default affine init is ones/zeros; perturb deterministically to
    # exercise the affine path.
    gamma_r = 1.0 + 0.1 * jax.random.normal(k_gr, (C,), dtype=jnp.float32)
    beta_r = 0.1 * jax.random.normal(k_br, (C,), dtype=jnp.float32)
    gamma_i = 1.0 + 0.1 * jax.random.normal(k_gi, (C,), dtype=jnp.float32)
    beta_i = 0.1 * jax.random.normal(k_bi, (C,), dtype=jnp.float32)

    out = cbatchnorm2d(x, gamma_r, beta_r, gamma_i, beta_i)
    out = jax.block_until_ready(out)

    ref = cbatchnorm2d_ref(x, gamma_r, beta_r, gamma_i, beta_i)
    assert out.shape == (N, C, H, W, 2)
    assert jnp.allclose(out, ref, atol=1e-4, rtol=1e-4), "mismatch vs reference"

    print("KERNEL_OK")
</pallas_src>

<mosaic_0001>
module attributes {stable_mosaic.version = 11 : i64} {
  func.func @_stats_kernel(%arg0: i32, %arg1: i32, %arg2: i32, %arg3: memref<8x512xf32, #tpu.memory_space<vmem>>, %arg4: memref<1x512xf32, #tpu.memory_space<vmem>>, %arg5: memref<1x8x1xf32, #tpu.memory_space<vmem>>, %arg6: memref<1x8x1xf32, #tpu.memory_space<vmem>>, %arg7: memref<1x8x1xf32, #tpu.memory_space<vmem>>, %arg8: memref<1x8x1xf32, #tpu.memory_space<vmem>>) attributes {dimension_semantics = [#tpu.dimension_semantics<parallel>, #tpu.dimension_semantics<parallel>, #tpu.dimension_semantics<arbitrary>], iteration_bounds = array<i64: 1, 1, 1>, scalar_prefetch = 0 : i64, scratch_operands = 0 : i64, tpu.core_type = #tpu.core_type<tc>, window_params = [{transform_indices = @transform_0, window_bounds = array<i64: 8, 512>}, {pipeline_mode = #tpu.pipeline_mode<synchronous>, transform_indices = @transform_1, window_bounds = array<i64: 1, 512>}, {transform_indices = @transform_2, window_bounds = array<i64: 1, 8, 1>}, {transform_indices = @transform_3, window_bounds = array<i64: 1, 8, 1>}, {transform_indices = @transform_4, window_bounds = array<i64: 1, 8, 1>}, {transform_indices = @transform_5, window_bounds = array<i64: 1, 8, 1>}]} {
    %c0_i32 = arith.constant 0 : i32
    %0 = arith.cmpi eq, %arg2, %c0_i32 : i32
    %1 = arith.extui %0 : i1 to i32
    %c0_i32_0 = arith.constant 0 : i32
    %2 = arith.cmpi ne, %1, %c0_i32_0 : i32
    scf.if %2 {
      %cst_31 = arith.constant 0.000000e+00 : f32
      %42 = vector.broadcast %cst_31 : f32 to vector<1x8x1xf32>
      %c0_32 = arith.constant 0 : index
      %c0_33 = arith.constant 0 : index
      %c0_34 = arith.constant 0 : index
      %43 = vector.load %arg5[%c0_32, %c0_33, %c0_34] : memref<1x8x1xf32, #tpu.memory_space<vmem>>, vector<1x8x1xf32>
      tpu.vector_store %arg5[%c0_32, %c0_33, %c0_34], %42 {strides = array<i32>} : memref<1x8x1xf32, #tpu.memory_space<vmem>>, vector<1x8x1xf32>,
      %cst_35 = arith.constant 0.000000e+00 : f32
      %44 = vector.broadcast %cst_35 : f32 to vector<1x8x1xf32>
      %c0_36 = arith.constant 0 : index
      %c0_37 = arith.constant 0 : index
      %c0_38 = arith.constant 0 : index
      %45 = vector.load %arg6[%c0_36, %c0_37, %c0_38] : memref<1x8x1xf32, #tpu.memory_space<vmem>>, vector<1x8x1xf32>
      tpu.vector_store %arg6[%c0_36, %c0_37, %c0_38], %44 {strides = array<i32>} : memref<1x8x1xf32, #tpu.memory_space<vmem>>, vector<1x8x1xf32>,
      %cst_39 = arith.constant 0.000000e+00 : f32
      %46 = vector.broadcast %cst_39 : f32 to vector<1x8x1xf32>
      %c0_40 = arith.constant 0 : index
      %c0_41 = arith.constant 0 : index
      %c0_42 = arith.constant 0 : index
      %47 = vector.load %arg7[%c0_40, %c0_41, %c0_42] : memref<1x8x1xf32, #tpu.memory_space<vmem>>, vector<1x8x1xf32>
      tpu.vector_store %arg7[%c0_40, %c0_41, %c0_42], %46 {strides = array<i32>} : memref<1x8x1xf32, #tpu.memory_space<vmem>>, vector<1x8x1xf32>,
      %cst_43 = arith.constant 0.000000e+00 : f32
      %48 = vector.broadcast %cst_43 : f32 to vector<1x8x1xf32>
      %c0_44 = arith.constant 0 : index
      %c0_45 = arith.constant 0 : index
      %c0_46 = arith.constant 0 : index
      %49 = vector.load %arg8[%c0_44, %c0_45, %c0_46] : memref<1x8x1xf32, #tpu.memory_space<vmem>>, vector<1x8x1xf32>
      tpu.vector_store %arg8[%c0_44, %c0_45, %c0_46], %48 {strides = array<i32>} : memref<1x8x1xf32, #tpu.memory_space<vmem>>, vector<1x8x1xf32>,
    } else {
    }
    %c0 = arith.constant 0 : index
    %c0_1 = arith.constant 0 : index
    %3 = vector.load %arg3[%c0, %c0_1] : memref<8x512xf32, #tpu.memory_space<vmem>>, vector<8x512xf32>
    %c0_2 = arith.constant 0 : index
    %c0_3 = arith.constant 0 : index
    %4 = vector.load %arg4[%c0_2, %c0_3] : memref<1x512xf32, #tpu.memory_space<vmem>>, vector<1x512xf32>
    %5 = vector.broadcast %4 : vector<1x512xf32> to vector<8x512xf32>
    %6 = arith.mulf %3, %5 : vector<8x512xf32>
    %7 = arith.mulf %3, %3 : vector<8x512xf32>
    %8 = vector.broadcast %4 : vector<1x512xf32> to vector<8x512xf32>
    %9 = arith.mulf %7, %8 : vector<8x512xf32>
    %c0_4 = arith.constant 0 : index
    %c0_5 = arith.constant 0 : index
    %c0_6 = arith.constant 0 : index
    %10 = vector.load %arg5[%c0_4, %c0_5, %c0_6] : memref<1x8x1xf32, #tpu.memory_space<vmem>>, vector<1x8x1xf32>
    %11 = vector.shape_cast %10 : vector<1x8x1xf32> to vector<8x1xf32>
    %cst = arith.constant dense<0.000000e+00> : vector<8xf32>
    %12 = vector.multi_reduction <add>, %6, %cst [1] : vector<8x512xf32> to vector<8xf32>
    %13 = vector.shape_cast %12 : vector<8xf32> to vector<8x1xf32>
    %14 = arith.addf %11, %13 : vector<8x1xf32>
    %c0_7 = arith.constant 0 : index
    %c0_8 = arith.constant 0 : index
    %c0_9 = arith.constant 0 : index
    %15 = vector.load %arg5[%c0_7, %c0_8, %c0_9] : memref<1x8x1xf32, #tpu.memory_space<vmem>>, vector<1x8x1xf32>
    %16 = vector.shape_cast %15 : vector<1x8x1xf32> to vector<8x1xf32>
    %17 = vector.shape_cast %14 : vector<8x1xf32> to vector<1x8x1xf32>
    tpu.vector_store %arg5[%c0_7, %c0_8, %c0_9], %17 {strides = array<i32>} : memref<1x8x1xf32, #tpu.memory_space<vmem>>, vector<1x8x1xf32>,
    %c0_10 = arith.constant 0 : index
    %c0_11 = arith.constant 0 : index
    %c0_12 = arith.constant 0 : index
    %18 = vector.load %arg6[%c0_10, %c0_11, %c0_12] : memref<1x8x1xf32, #tpu.memory_space<vmem>>, vector<1x8x1xf32>
    %19 = vector.shape_cast %18 : vector<1x8x1xf32> to vector<8x1xf32>
    %cst_13 = arith.constant dense<0.000000e+00> : vector<8xf32>
    %20 = vector.multi_reduction <add>, %3, %cst_13 [1] : vector<8x512xf32> to vector<8xf32>
    %21 = vector.shape_cast %20 : vector<8xf32> to vector<8x1xf32>
    %22 = arith.addf %19, %21 : vector<8x1xf32>
    %c0_14 = arith.constant 0 : index
    %c0_15 = arith.constant 0 : index
    %c0_16 = arith.constant 0 : index
    %23 = vector.load %arg6[%c0_14, %c0_15, %c0_16] : memref<1x8x1xf32, #tpu.memory_space<vmem>>, vector<1x8x1xf32>
    %24 = vector.shape_cast %23 : vector<1x8x1xf32> to vector<8x1xf32>
    %25 = vector.shape_cast %22 : vector<8x1xf32> to vector<1x8x1xf32>
    tpu.vector_store %arg6[%c0_14, %c0_15, %c0_16], %25 {strides = array<i32>} : memref<1x8x1xf32, #tpu.memory_space<vmem>>, vector<1x8x1xf32>,
    %c0_17 = arith.constant 0 : index
    %c0_18 = arith.constant 0 : index
    %c0_19 = arith.constant 0 : index
    %26 = vector.load %arg7[%c0_17, %c0_18, %c0_19] : memref<1x8x1xf32, #tpu.memory_space<vmem>>, vector<1x8x1xf32>
    %27 = vector.shape_cast %26 : vector<1x8x1xf32> to vector<8x1xf32>
    %cst_20 = arith.constant dense<0.000000e+00> : vector<8xf32>
    %28 = vector.multi_reduction <add>, %9, %cst_20 [1] : vector<8x512xf32> to vector<8xf32>
    %29 = vector.shape_cast %28 : vector<8xf32> to vector<8x1xf32>
    %30 = arith.addf %27, %29 : vector<8x1xf32>
    %c0_21 = arith.constant 0 : index
    %c0_22 = arith.constant 0 : index
    %c0_23 = arith.constant 0 : index
    %31 = vector.load %arg7[%c0_21, %c0_22, %c0_23] : memref<1x8x1xf32, #tpu.memory_space<vmem>>, vector<1x8x1xf32>
    %32 = vector.shape_cast %31 : vector<1x8x1xf32> to vector<8x1xf32>
    %33 = vector.shape_cast %30 : vector<8x1xf32> to vector<1x8x1xf32>
    tpu.vector_store %arg7[%c0_21, %c0_22, %c0_23], %33 {strides = array<i32>} : memref<1x8x1xf32, #tpu.memory_space<vmem>>, vector<1x8x1xf32>,
    %c0_24 = arith.constant 0 : index
    %c0_25 = arith.constant 0 : index
    %c0_26 = arith.constant 0 : index
    %34 = vector.load %arg8[%c0_24, %c0_25, %c0_26] : memref<1x8x1xf32, #tpu.memory_space<vmem>>, vector<1x8x1xf32>
    %35 = vector.shape_cast %34 : vector<1x8x1xf32> to vector<8x1xf32>
    %cst_27 = arith.constant dense<0.000000e+00> : vector<8xf32>
    %36 = vector.multi_reduction <add>, %7, %cst_27 [1] : vector<8x512xf32> to vector<8xf32>
    %37 = vector.shape_cast %36 : vector<8xf32> to vector<8x1xf32>
    %38 = arith.addf %35, %37 : vector<8x1xf32>
    %c0_28 = arith.constant 0 : index
    %c0_29 = arith.constant 0 : index
    %c0_30 = arith.constant 0 : index
    %39 = vector.load %arg8[%c0_28, %c0_29, %c0_30] : memref<1x8x1xf32, #tpu.memory_space<vmem>>, vector<1x8x1xf32>
    %40 = vector.shape_cast %39 : vector<1x8x1xf32> to vector<8x1xf32>
    %41 = vector.shape_cast %38 : vector<8x1xf32> to vector<1x8x1xf32>
    tpu.vector_store %arg8[%c0_28, %c0_29, %c0_30], %41 {strides = array<i32>} : memref<1x8x1xf32, #tpu.memory_space<vmem>>, vector<1x8x1xf32>,
    return
  }
  func.func @transform_0(%arg0: i32, %arg1: i32, %arg2: i32) -> (i32, i32) {
    %c1_i32 = arith.constant 1 : i32
    %0 = arith.muli %arg1, %c1_i32 : i32
    %1 = arith.addi %0, %arg2 : i32
    %c0_i32 = arith.constant 0 : i32
    return %arg0, %1 : i32, i32
  }
  func.func @transform_1(%arg0: i32, %arg1: i32, %arg2: i32) -> (i32, i32) {
    %c0_i32 = arith.constant 0 : i32
    %c0_i32_0 = arith.constant 0 : i32
    %c0_i32_1 = arith.constant 0 : i32
    return %c0_i32, %c0_i32_0 : i32, i32
  }
  func.func @transform_2(%arg0: i32, %arg1: i32, %arg2: i32) -> (i32, i32, i32) {
    %c0_i32 = arith.constant 0 : i32
    %c0_i32_0 = arith.constant 0 : i32
    return %arg1, %arg0, %c0_i32 : i32, i32, i32
  }
  func.func @transform_3(%arg0: i32, %arg1: i32, %arg2: i32) -> (i32, i32, i32) {
    %c0_i32 = arith.constant 0 : i32
    %c0_i32_0 = arith.constant 0 : i32
    return %arg1, %arg0, %c0_i32 : i32, i32, i32
  }
  func.func @transform_4(%arg0: i32, %arg1: i32, %arg2: i32) -> (i32, i32, i32) {
    %c0_i32 = arith.constant 0 : i32
    %c0_i32_0 = arith.constant 0 : i32
    return %arg1, %arg0, %c0_i32 : i32, i32, i32
  }
  func.func @transform_5(%arg0: i32, %arg1: i32, %arg2: i32) -> (i32, i32, i32) {
    %c0_i32 = arith.constant 0 : i32
    %c0_i32_0 = arith.constant 0 : i32
    return %arg1, %arg0, %c0_i32 : i32, i32, i32
  }
}

module attributes {stable_mosaic.version = 11 : i64} {
  func.func @_norm_kernel(%arg0: i32, %arg1: i32, %arg2: memref<8x512xf32, #tpu.memory_space<vmem>>, %arg3: memref<1x512xf32, #tpu.memory_space<vmem>>, %arg4: memref<8x2xf32, #tpu.memory_space<vmem>>, %arg5: memref<8x2xf32, #tpu.memory_space<vmem>>, %arg6: memref<8x512xf32, #tpu.memory_space<vmem>>) attributes {dimension_semantics = [#tpu.dimension_semantics<parallel>, #tpu.dimension_semantics<parallel>], iteration_bounds = array<i64: 1, 1>, scalar_prefetch = 0 : i64, scratch_operands = 0 : i64, tpu.core_type = #tpu.core_type<tc>, window_params = [{transform_indices = @transform_0, window_bounds = array<i64: 8, 512>}, {pipeline_mode = #tpu.pipeline_mode<synchronous>, transform_indices = @transform_1, window_bounds = array<i64: 1, 512>}, {transform_indices = @transform_2, window_bounds = array<i64: 8, 2>}, {transform_indices = @transform_3, window_bounds = array<i64: 8, 2>}, {transform_indices = @transform_4, window_bounds = array<i64: 8, 512>}]} {
    %c0 = arith.constant 0 : index
    %c0_0 = arith.constant 0 : index
    %0 = vector.load %arg2[%c0, %c0_0] : memref<8x512xf32, #tpu.memory_space<vmem>>, vector<8x512xf32>
    %c0_1 = arith.constant 0 : index
    %c0_2 = arith.constant 0 : index
    %1 = vector.load %arg3[%c0_1, %c0_2] : memref<1x512xf32, #tpu.memory_space<vmem>>, vector<1x512xf32>
    %2 = vector.shape_cast %1 : vector<1x512xf32> to vector<1x512xf32>
    %3 = vector.broadcast %2 : vector<1x512xf32> to vector<8x512xf32>
    %cst = arith.constant 5.000000e-01 : f32
    %4 = vector.broadcast %cst : f32 to vector<8x512xf32>
    %5 = arith.cmpf ogt, %3, %4 : vector<8x512xf32>
    %c0_3 = arith.constant 0 : index
    %c0_4 = arith.constant 0 : index
    %6 = vector.load %arg4[%c0_3, %c0_4] : memref<8x2xf32, #tpu.memory_space<vmem>>, vector<8x1xf32>
    %7 = vector.shape_cast %6 : vector<8x1xf32> to vector<8x1xf32>
    %8 = vector.broadcast %7 : vector<8x1xf32> to vector<8x512xf32>
    %c0_5 = arith.constant 0 : index
    %c1 = arith.constant 1 : index
    %9 = vector.load %arg4[%c0_5, %c1] : memref<8x2xf32, #tpu.memory_space<vmem>>, vector<8x1xf32>
    %10 = vector.shape_cast %9 : vector<8x1xf32> to vector<8x1xf32>
    %11 = vector.broadcast %10 : vector<8x1xf32> to vector<8x512xf32>
    %12 = arith.select %5, %8, %11 : vector<8x512xi1>, vector<8x512xf32>
    %c0_6 = arith.constant 0 : index
    %c0_7 = arith.constant 0 : index
    %13 = vector.load %arg5[%c0_6, %c0_7] : memref<8x2xf32, #tpu.memory_space<vmem>>, vector<8x1xf32>
    %14 = vector.shape_cast %13 : vector<8x1xf32> to vector<8x1xf32>
    %15 = vector.broadcast %14 : vector<8x1xf32> to vector<8x512xf32>
    %c0_8 = arith.constant 0 : index
    %c1_9 = arith.constant 1 : index
    %16 = vector.load %arg5[%c0_8, %c1_9] : memref<8x2xf32, #tpu.memory_space<vmem>>, vector<8x1xf32>
    %17 = vector.shape_cast %16 : vector<8x1xf32> to vector<8x1xf32>
    %18 = vector.broadcast %17 : vector<8x1xf32> to vector<8x512xf32>
    %19 = arith.select %5, %15, %18 : vector<8x512xi1>, vector<8x512xf32>
    %20 = arith.mulf %0, %12 : vector<8x512xf32>
    %21 = arith.addf %20, %19 : vector<8x512xf32>
    %c0_10 = arith.constant 0 : index
    %c0_11 = arith.constant 0 : index
    %22 = vector.load %arg6[%c0_10, %c0_11] : memref<8x512xf32, #tpu.memory_space<vmem>>, vector<8x512xf32>
    tpu.vector_store %arg6[%c0_10, %c0_11], %21 {strides = array<i32>} : memref<8x512xf32, #tpu.memory_space<vmem>>, vector<8x512xf32>,
    return
  }
  func.func @transform_0(%arg0: i32, %arg1: i32) -> (i32, i32) {
    %c0_i32 = arith.constant 0 : i32
    return %arg0, %arg1 : i32, i32
  }
  func.func @transform_1(%arg0: i32, %arg1: i32) -> (i32, i32) {
    %c0_i32 = arith.constant 0 : i32
    %c0_i32_0 = arith.constant 0 : i32
    %c0_i32_1 = arith.constant 0 : i32
    return %c0_i32, %c0_i32_0 : i32, i32
  }
  func.func @transform_2(%arg0: i32, %arg1: i32) -> (i32, i32) {
    %c0_i32 = arith.constant 0 : i32
    %c0_i32_0 = arith.constant 0 : i32
    return %arg0, %c0_i32 : i32, i32
  }
  func.func @transform_3(%arg0: i32, %arg1: i32) -> (i32, i32) {
    %c0_i32 = arith.constant 0 : i32
    %c0_i32_0 = arith.constant 0 : i32
    return %arg0, %c0_i32 : i32, i32
  }
  func.func @transform_4(%arg0: i32, %arg1: i32) -> (i32, i32) {
    %c0_i32 = arith.constant 0 : i32
    return %arg0, %arg1 : i32, i32
  }
}

</mosaic_0001>

<bundles_post_ra>
// kernel: tile.16
= control target key start
LH: loop header
LB: loop body
LE: loop exit
PB: predicated region body
PF: predicated region fallthrough
CT: control target
= control target key end

     0   :  { %s208_s0 = inlined_call_operand.vmem [shape: f32[2], index: 0, kind: input, shape index: {}]   ;;  %s209_s1 = inlined_call_operand.vmem [shape: f32[256,2], index: 1, kind: output, shape index: {}]  }
   0x1   :  { %v4_v0 = vld [vmem:[%s208_s0] ss:$0 sm:$0xff] }
   0x2   :  { %5 = vst [vmem:[%s209_s1] sm:$0xff] %v4_v0  ;;  %68 = vst [vmem:[%s209_s1 + $0x8] sm:$0xff] %v4_v0 }
   0x3   :  { %69 = vst [vmem:[%s209_s1 + $0x10] sm:$0xff] %v4_v0  ;;  %70 = vst [vmem:[%s209_s1 + $0x18] sm:$0xff] %v4_v0 }
   0x4   :  { %71 = vst [vmem:[%s209_s1 + $0x20] sm:$0xff] %v4_v0  ;;  %72 = vst [vmem:[%s209_s1 + $0x28] sm:$0xff] %v4_v0 }
   0x5   :  { %73 = vst [vmem:[%s209_s1 + $0x30] sm:$0xff] %v4_v0  ;;  %74 = vst [vmem:[%s209_s1 + $0x38] sm:$0xff] %v4_v0 }
   0x6   :  { %75 = vst [vmem:[%s209_s1 + $0x40] sm:$0xff] %v4_v0  ;;  %76 = vst [vmem:[%s209_s1 + $0x48] sm:$0xff] %v4_v0 }
   0x7   :  { %77 = vst [vmem:[%s209_s1 + $0x50] sm:$0xff] %v4_v0  ;;  %78 = vst [vmem:[%s209_s1 + $0x58] sm:$0xff] %v4_v0 }
   0x8   :  { %79 = vst [vmem:[%s209_s1 + $0x60] sm:$0xff] %v4_v0  ;;  %80 = vst [vmem:[%s209_s1 + $0x68] sm:$0xff] %v4_v0 }
   0x9   :  { %81 = vst [vmem:[%s209_s1 + $0x70] sm:$0xff] %v4_v0  ;;  %82 = vst [vmem:[%s209_s1 + $0x78] sm:$0xff] %v4_v0 }
   0xa   :  { %83 = vst [vmem:[%s209_s1 + $0x80] sm:$0xff] %v4_v0  ;;  %84 = vst [vmem:[%s209_s1 + $0x88] sm:$0xff] %v4_v0 }
   0xb   :  { %85 = vst [vmem:[%s209_s1 + $0x90] sm:$0xff] %v4_v0  ;;  %86 = vst [vmem:[%s209_s1 + $0x98] sm:$0xff] %v4_v0 }
   0xc   :  { %87 = vst [vmem:[%s209_s1 + $0xa0] sm:$0xff] %v4_v0  ;;  %88 = vst [vmem:[%s209_s1 + $0xa8] sm:$0xff] %v4_v0 }
   0xd   :  { %89 = vst [vmem:[%s209_s1 + $0xb0] sm:$0xff] %v4_v0  ;;  %90 = vst [vmem:[%s209_s1 + $0xb8] sm:$0xff] %v4_v0 }
   0xe   :  { %91 = vst [vmem:[%s209_s1 + $0xc0] sm:$0xff] %v4_v0  ;;  %92 = vst [vmem:[%s209_s1 + $0xc8] sm:$0xff] %v4_v0 }
   0xf   :  { %93 = vst [vmem:[%s209_s1 + $0xd0] sm:$0xff] %v4_v0  ;;  %94 = vst [vmem:[%s209_s1 + $0xd8] sm:$0xff] %v4_v0 }
  0x10   :  { %95 = vst [vmem:[%s209_s1 + $0xe0] sm:$0xff] %v4_v0  ;;  %96 = vst [vmem:[%s209_s1 + $0xe8] sm:$0xff] %v4_v0 }
  0x11   :  { %97 = vst [vmem:[%s209_s1 + $0xf0] sm:$0xff] %v4_v0  ;;  %98 = vst [vmem:[%s209_s1 + $0xf8] sm:$0xff] %v4_v0 }

// kernel: tile.17
= control target key start
LH: loop header
LB: loop body
LE: loop exit
PB: predicated region body
PF: predicated region fallthrough
CT: control target
= control target key end

     0   :  { %vm5_vm0 = vcmask 1041409   ;;  %vm9_vm1 = vcmask 1042434   ;;  %vm13_vm2 = vcmask 1043459   ;;  %s1497_s30 = smov 126   ;;  %s1498_s8 = smov 122   ;;  %vm15_vm3 = vcmask 15360   ;;  %s2544_s0 = inlined_call_operand.vmem [shape: f32[256,2], index: 0, kind: input, shape index: {}]   ;;  %s2545_s1 = inlined_call_operand.vmem [shape: f32[1,512], index: 1, kind: output, shape index: {}]  }
   0x1   :  { %v1179_v0 = vld [vmem:[%s2544_s0 + $0x3f] sm:$0x1]   ;;  %v1187_v5 = vld [vmem:[%s2544_s0 + $0x3d] sm:$0x1]   ;;  %v1183_v11 = vld [vmem:[%s2544_s0 + $0x3e] sm:$0x1]  }
   0x2   :  { %v1180_v1 = vld [vmem:[%s2544_s0 + $0x7e] sm:$0x2]   ;;  %v1188_v6 = vld [vmem:[%s2544_s0 + $0x7c] sm:$0x2]   ;;  %v1184_v14 = vld [vmem:[%s2544_s0 + $0x7d] sm:$0x2]  }
   0x3   :  { %v1181_v2 = vld [vmem:[%s2544_s0 + $0xbd] sm:$0x4]   ;;  %v22_v4 = vsel %vm5_vm0, %v1180_v1, %v1179_v0  ;;  %v1189_v7 = vld [vmem:[%s2544_s0 + $0xbb] sm:$0x4]   ;;  %v58_v9 = vsel %vm5_vm0, %v1188_v6, %v1187_v5  ;;  %v1185_v15 = vld [vmem:[%s2544_s0 + $0xbc] sm:$0x4]   ;;  %v40_v18 = vsel %vm5_vm0, %v1184_v14, %v1183_v11 }
   0x4   :  { %v1182_v3 = vld [vmem:[%s2544_s0 + $0xfc] sm:$0x8]   ;;  %v26_v8 = vsel %vm9_vm1, %v1181_v2, %v22_v4  ;;  %v1190_v10 = vld [vmem:[%s2544_s0 + $0xfa] sm:$0x8]   ;;  %v62_v13 = vsel %vm9_vm1, %v1189_v7, %v58_v9  ;;  %v1186_v16 = vld [vmem:[%s2544_s0 + $0xfb] sm:$0x8]   ;;  %v44_v22 = vsel %vm9_vm1, %v1185_v15, %v40_v18 }
   0x5   :  { %v30_v12 = vsel %vm13_vm2, %v1182_v3, %v26_v8  ;;  %v66_v17 = vsel %vm13_vm2, %v1190_v10, %v62_v13  ;;  %v1191_v19 = vld [vmem:[%s2544_s0 + $0x3c] sm:$0x1]   ;;  %v1195_v25 = vld [vmem:[%s2544_s0 + $0x3b] sm:$0x1]   ;;  %v48_v26 = vsel %vm13_vm2, %v1186_v16, %v44_v22  ;;  %v1199_v33 = vld [vmem:[%s2544_s0 + $0x3a] sm:$0x1]  }
   0x6   :  { %31 = vrot.lane.b32.xlu0 %v30_v12, %s1497_s30  ;;  %v1192_v20 = vld [vmem:[%s2544_s0 + $0x7b] sm:$0x2]   ;;  %67 = vrot.lane.b32.xlu1 %v66_v17, %s1498_s8  ;;  %v1196_v28 = vld [vmem:[%s2544_s0 + $0x7a] sm:$0x2]   ;;  %s1499_s25 = smov 124   ;;  %s1500_s30 = smov 120  }
   0x7   :  { %v1193_v21 = vld [vmem:[%s2544_s0 + $0xba] sm:$0x4]   ;;  %v76_v23 = vsel %vm5_vm0, %v1192_v20, %v1191_v19  ;;  %v1197_v29 = vld [vmem:[%s2544_s0 + $0xb9] sm:$0x4]   ;;  %v94_v32 = vsel %vm5_vm0, %v1196_v28, %v1195_v25  ;;  %v1200_v34 = vld [vmem:[%s2544_s0 + $0x79] sm:$0x2]  }
   0x8   :  { %v1194_v24 = vld [vmem:[%s2544_s0 + $0xf9] sm:$0x8]   ;;  %v80_v27 = vsel %vm9_vm1, %v1193_v21, %v76_v23  ;;  %v1198_v30 = vld [vmem:[%s2544_s0 + $0xf8] sm:$0x8]   ;;  %v1201_v35 = vld [vmem:[%s2544_s0 + $0xb8] sm:$0x4]   ;;  %v98_v36 = vsel %vm9_vm1, %v1197_v29, %v94_v32  ;;  %v112_v37 = vsel %vm5_vm0, %v1200_v34, %v1199_v33 }
   0x9   :  { %v84_v31 = vsel %vm13_vm2, %v1194_v24, %v80_v27  ;;  %v1202_v38 = vld [vmem:[%s2544_s0 + $0xf7] sm:$0x8]   ;;  %v1203_v39 = vld [vmem:[%s2544_s0 + $0x39] sm:$0x1]   ;;  %v102_v40 = vsel %vm13_vm2, %v1198_v30, %v98_v36  ;;  %v116_v41 = vsel %vm9_vm1, %v1201_v35, %v112_v37  ;;  %v1207_v47 = vld [vmem:[%s2544_s0 + $0x38] sm:$0x1]  }
   0xa   :  { %49 = vrot.lane.b32.xlu0 %v48_v26, %s1499_s25  ;;  %85 = vrot.lane.b32.xlu1 %v84_v31, %s1500_s30  ;;  %v1204_v42 = vld [vmem:[%s2544_s0 + $0x78] sm:$0x2]   ;;  %v120_v45 = vsel %vm13_vm2, %v1202_v38, %v116_v41  ;;  %v1208_v48 = vld [vmem:[%s2544_s0 + $0x77] sm:$0x2]   ;;  %s1501_s18 = smov 118   ;;  %s1502_s23 = smov 116  }
   0xb   :  { %v1205_v43 = vld [vmem:[%s2544_s0 + $0xb7] sm:$0x4]   ;;  %v130_v46 = vsel %vm5_vm0, %v1204_v42, %v1203_v39  ;;  %v1209_v49 = vld [vmem:[%s2544_s0 + $0xb6] sm:$0x4]   ;;  %v148_v51 = vsel %vm5_vm0, %v1208_v48, %v1207_v47  ;;  %v1211_v53 = vld [vmem:[%s2544_s0 + $0x37] sm:$0x1]  }
   0xc   :  { %v1206_v44 = vld [vmem:[%s2544_s0 + $0xf6] sm:$0x8]   ;;  %v134_v50 = vsel %vm9_vm1, %v1205_v43, %v130_v46  ;;  %v1210_v52 = vld [vmem:[%s2544_s0 + $0xf5] sm:$0x8]   ;;  %v152_v54 = vsel %vm9_vm1, %v1209_v49, %v148_v51  ;;  %v1212_v55 = vld [vmem:[%s2544_s0 + $0x76] sm:$0x2]  }
   0xd   :  { %v1213_v56 = vld [vmem:[%s2544_s0 + $0xb5] sm:$0x4]   ;;  %v138_v57 = vsel %vm13_vm2, %v1206_v44, %v134_v50  ;;  %v166_v58 = vsel %vm5_vm0, %v1212_v55, %v1211_v53  ;;  %v1215_v59 = vld [vmem:[%s2544_s0 + $0x36] sm:$0x1]   ;;  %v156_v62 = vsel %vm13_vm2, %v1210_v52, %v152_v54  ;;  %v1219_v2 = vld [vmem:[%s2544_s0 + $0x35] sm:$0x1]  }
   0xe   :  { %103 = vrot.lane.b32.xlu0 %v102_v40, %s1501_s18  ;;  %121 = vrot.lane.b32.xlu1 %v120_v45, %s1502_s23  ;;  %v1216_v60 = vld [vmem:[%s2544_s0 + $0x75] sm:$0x2]   ;;  %v170_v63 = vsel %vm9_vm1, %v1213_v56, %v166_v58  ;;  %v1214_v0 = vld [vmem:[%s2544_s0 + $0xf4] sm:$0x8]   ;;  %s1503_s11 = smov 114   ;;  %s1504_s18 = smov 112  }
   0xf   :  { %v1217_v61 = vld [vmem:[%s2544_s0 + $0xb4] sm:$0x4]   ;;  %v184_v1 = vsel %vm5_vm0, %v1216_v60, %v1215_v59  ;;  %v1220_v5 = vld [vmem:[%s2544_s0 + $0x74] sm:$0x2]   ;;  %v1223_v8 = vld [vmem:[%s2544_s0 + $0x34] sm:$0x1]   ;;  %v174_v11 = vsel %vm13_vm2, %v1214_v0, %v170_v63 }
  0x10   :  { %v188_v3 = vsel %vm9_vm1, %v1217_v61, %v184_v1  ;;  %v1218_v4 = vld [vmem:[%s2544_s0 + $0xf3] sm:$0x8]   ;;  %v1221_v6 = vld [vmem:[%s2544_s0 + $0xb3] sm:$0x4]   ;;  %v202_v7 = vsel %vm5_vm0, %v1220_v5, %v1219_v2  ;;  %v1224_v9 = vld [vmem:[%s2544_s0 + $0x73] sm:$0x2]  }
  0x11   :  { %v1225_v10 = vld [vmem:[%s2544_s0 + $0xb2] sm:$0x4]   ;;  %v220_v12 = vsel %vm5_vm0, %v1224_v9, %v1223_v8  ;;  %v1227_v13 = vld [vmem:[%s2544_s0 + $0x33] sm:$0x1]   ;;  %v192_v14 = vsel %vm13_vm2, %v1218_v4, %v188_v3  ;;  %v206_v15 = vsel %vm9_vm1, %v1221_v6, %v202_v7  ;;  %v1222_v16 = vld [vmem:[%s2544_s0 + $0xf2] sm:$0x8]  }
  0x12   :  { %139 = vrot.lane.b32.xlu0 %v138_v57, %s1503_s11  ;;  %157 = vrot.lane.b32.xlu1 %v156_v62, %s1504_s18  ;;  %v1226_v17 = vld [vmem:[%s2544_s0 + $0xf1] sm:$0x8]   ;;  %v1228_v18 = vld [vmem:[%s2544_s0 + $0x72] sm:$0x2]   ;;  %v224_v19 = vsel %vm9_vm1, %v1225_v10, %v220_v12  ;;  %s1505_s4 = smov 110   ;;  %s1506_s9 = smov 108   ;;  %v210_v27 = vsel %vm13_vm2, %v1222_v16, %v206_v15 }
  0x13   :  { %v238_v20 = vsel %vm5_vm0, %v1228_v18, %v1227_v13  ;;  %v1229_v21 = vld [vmem:[%s2544_s0 + $0xb1] sm:$0x4]   ;;  %v1231_v22 = vld [vmem:[%s2544_s0 + $0x32] sm:$0x1]   ;;  %v1235_v26 = vld [vmem:[%s2544_s0 + $0x31] sm:$0x1]   ;;  %v228_v29 = vsel %vm13_vm2, %v1226_v17, %v224_v19 }
  0x14   :  { %v1232_v23 = vld [vmem:[%s2544_s0 + $0x71] sm:$0x2]   ;;  %v1236_v28 = vld [vmem:[%s2544_s0 + $0x70] sm:$0x2]   ;;  %v242_v30 = vsel %vm9_vm1, %v1229_v21, %v238_v20  ;;  %v1230_v31 = vld [vmem:[%s2544_s0 + $0xf0] sm:$0x8]  }
  0x15   :  { %v256_v24 = vsel %vm5_vm0, %v1232_v23, %v1231_v22  ;;  %v1233_v25 = vld [vmem:[%s2544_s0 + $0xb0] sm:$0x4]   ;;  %v1239_v32 = vld [vmem:[%s2544_s0 + $0x30] sm:$0x1]   ;;  %v274_v36 = vsel %vm5_vm0, %v1236_v28, %v1235_v26  ;;  %v1237_v37 = vld [vmem:[%s2544_s0 + $0xaf] sm:$0x4]   ;;  %v246_v42 = vsel %vm13_vm2, %v1230_v31, %v242_v30 }
  0x16   :  { %175 = vrot.lane.b32.xlu0 %v174_v11, %s1505_s4  ;;  %193 = vrot.lane.b32.xlu1 %v192_v14, %s1506_s9  ;;  %v1240_v33 = vld [vmem:[%s2544_s0 + $0x6f] sm:$0x2]   ;;  %v260_v34 = vsel %vm9_vm1, %v1233_v25, %v256_v24  ;;  %v1234_v35 = vld [vmem:[%s2544_s0 + $0xef] sm:$0x8]   ;;  %s1507_s22 = smov 106   ;;  %s1508_s29 = smov 104   ;;  %v278_v46 = vsel %vm9_vm1, %v1237_v37, %v274_v36 }
  0x17   :  { %v292_v38 = vsel %vm5_vm0, %v1240_v33, %v1239_v32  ;;  %v1241_v39 = vld [vmem:[%s2544_s0 + $0xae] sm:$0x4]   ;;  %v1243_v40 = vld [vmem:[%s2544_s0 + $0x2f] sm:$0x1]   ;;  %v1247_v43 = vld [vmem:[%s2544_s0 + $0x2e] sm:$0x1]   ;;  %v264_v45 = vsel %vm13_vm2, %v1234_v35, %v260_v34 }
  0x18   :  { %v1244_v41 = vld [vmem:[%s2544_s0 + $0x6e] sm:$0x2]   ;;  %v1248_v44 = vld [vmem:[%s2544_s0 + $0x6d] sm:$0x2]   ;;  %v1238_v47 = vld [vmem:[%s2544_s0 + $0xee] sm:$0x8]   ;;  %v296_v48 = vsel %vm9_vm1, %v1241_v39, %v292_v38 }
  0x19   :  { %v1242_v49 = vld [vmem:[%s2544_s0 + $0xed] sm:$0x8]   ;;  %v310_v50 = vsel %vm5_vm0, %v1244_v41, %v1243_v40  ;;  %v1245_v51 = vld [vmem:[%s2544_s0 + $0xad] sm:$0x4]   ;;  %s1509_s11 = smov 102   ;;  %v328_v52 = vsel %vm5_vm0, %v1248_v44, %v1247_v43  ;;  %s1510_s18 = smov 100   ;;  %v282_v56 = vsel %vm13_vm2, %v1238_v47, %v278_v46 }
  0x1a   :  { %211 = vrot.lane.b32.xlu0 %v210_v27, %s1507_s22  ;;  %229 = vrot.lane.b32.xlu1 %v228_v29, %s1508_s29  ;;  %v1249_v53 = vld [vmem:[%s2544_s0 + $0xac] sm:$0x4]   ;;  %v1251_v54 = vld [vmem:[%s2544_s0 + $0x2d] sm:$0x1]   ;;  %v300_v59 = vsel %vm13_vm2, %v1242_v49, %v296_v48  ;;  %v314_v60 = vsel %vm9_vm1, %v1245_v51, %v310_v50  ;;  %s1511_s29 = smov 98   ;;  %s1512_s7 = smov 96  }
  0x1b   :  { %v1252_v55 = vld [vmem:[%s2544_s0 + $0x6c] sm:$0x2]   ;;  %v1255_v57 = vld [vmem:[%s2544_s0 + $0x2c] sm:$0x1]   ;;  %v1246_v61 = vld [vmem:[%s2544_s0 + $0xec] sm:$0x8]   ;;  %v332_v62 = vsel %vm9_vm1, %v1249_v53, %v328_v52 }
  0x1c   :  { %v1256_v58 = vld [vmem:[%s2544_s0 + $0x6b] sm:$0x2]   ;;  %v1250_v63 = vld [vmem:[%s2544_s0 + $0xeb] sm:$0x8]   ;;  %v346_v0 = vsel %vm5_vm0, %v1252_v55, %v1251_v54  ;;  %v1253_v1 = vld [vmem:[%s2544_s0 + $0xab] sm:$0x4]   ;;  %v318_v6 = vsel %vm13_vm2, %v1246_v61, %v314_v60 }
  0x1d   :  { %v364_v2 = vsel %vm5_vm0, %v1256_v58, %v1255_v57  ;;  %v1257_v3 = vld [vmem:[%s2544_s0 + $0xaa] sm:$0x4]   ;;  %v1259_v4 = vld [vmem:[%s2544_s0 + $0x2b] sm:$0x1]   ;;  %v1263_v7 = vld [vmem:[%s2544_s0 + $0x2a] sm:$0x1]   ;;  %v336_v9 = vsel %vm13_vm2, %v1250_v63, %v332_v62  ;;  %v350_v10 = vsel %vm9_vm1, %v1253_v1, %v346_v0 }
  0x1e   :  { %247 = vrot.lane.b32.xlu0 %v246_v42, %s1509_s11  ;;  %265 = vrot.lane.b32.xlu1 %v264_v45, %s1510_s18  ;;  %v1260_v5 = vld [vmem:[%s2544_s0 + $0x6a] sm:$0x2]   ;;  %v1264_v8 = vld [vmem:[%s2544_s0 + $0x69] sm:$0x2]   ;;  %v368_v12 = vsel %vm9_vm1, %v1257_v3, %v364_v2  ;;  %s1513_s18 = smov 94   ;;  %s1514_s25 = smov 92  }
  0x1f   :  { %v1254_v11 = vld [vmem:[%s2544_s0 + $0xea] sm:$0x8]   ;;  %v1258_v13 = vld [vmem:[%s2544_s0 + $0xe9] sm:$0x8]   ;;  %v382_v14 = vsel %vm5_vm0, %v1260_v5, %v1259_v4  ;;  %v1261_v15 = vld [vmem:[%s2544_s0 + $0xa9] sm:$0x4]   ;;  %v400_v16 = vsel %vm5_vm0, %v1264_v8, %v1263_v7 }
  0x20   :  { %v1265_v17 = vld [vmem:[%s2544_s0 + $0xa8] sm:$0x4]   ;;  %v1267_v18 = vld [vmem:[%s2544_s0 + $0x29] sm:$0x1]   ;;  %v354_v20 = vsel %vm13_vm2, %v1254_v11, %v350_v10  ;;  %v1271_v21 = vld [vmem:[%s2544_s0 + $0x28] sm:$0x1]   ;;  %v372_v23 = vsel %vm13_vm2, %v1258_v13, %v368_v12  ;;  %v386_v24 = vsel %vm9_vm1, %v1261_v15, %v382_v14 }
  0x21   :  { %v1268_v19 = vld [vmem:[%s2544_s0 + $0x68] sm:$0x2]   ;;  %v1272_v22 = vld [vmem:[%s2544_s0 + $0x67] sm:$0x2]   ;;  %v1262_v25 = vld [vmem:[%s2544_s0 + $0xe8] sm:$0x8]   ;;  %v404_v26 = vsel %vm9_vm1, %v1265_v17, %v400_v16 }
  0x22   :  { %283 = vrot.lane.b32.xlu0 %v282_v56, %s1511_s29  ;;  %301 = vrot.lane.b32.xlu1 %v300_v59, %s1512_s7  ;;  %v1266_v27 = vld [vmem:[%s2544_s0 + $0xe7] sm:$0x8]   ;;  %v418_v28 = vsel %vm5_vm0, %v1268_v19, %v1267_v18  ;;  %v1269_v29 = vld [vmem:[%s2544_s0 + $0xa7] sm:$0x4]   ;;  %s1515_s7 = smov 90   ;;  %v436_v30 = vsel %vm5_vm0, %v1272_v22, %v1271_v21  ;;  %s1516_s14 = smov 88   ;;  %v390_v34 = vsel %vm13_vm2, %v1262_v25, %v386_v24 }
  0x23   :  { %v1273_v31 = vld [vmem:[%s2544_s0 + $0xa6] sm:$0x4]   ;;  %v1275_v32 = vld [vmem:[%s2544_s0 + $0x27] sm:$0x1]   ;;  %v1279_v35 = vld [vmem:[%s2544_s0 + $0x26] sm:$0x1]   ;;  %v408_v37 = vsel %vm13_vm2, %v1266_v27, %v404_v26  ;;  %v422_v38 = vsel %vm9_vm1, %v1269_v29, %v418_v28 }
  0x24   :  { %v1276_v33 = vld [vmem:[%s2544_s0 + $0x66] sm:$0x2]   ;;  %v1280_v36 = vld [vmem:[%s2544_s0 + $0x65] sm:$0x2]   ;;  %v1270_v39 = vld [vmem:[%s2544_s0 + $0xe6] sm:$0x8]   ;;  %v440_v40 = vsel %vm9_vm1, %v1273_v31, %v436_v30 }
  0x25   :  { %v1274_v41 = vld [vmem:[%s2544_s0 + $0xe5] sm:$0x8]   ;;  %v454_v42 = vsel %vm5_vm0, %v1276_v33, %v1275_v32  ;;  %v1277_v43 = vld [vmem:[%s2544_s0 + $0xa5] sm:$0x4]   ;;  %v472_v44 = vsel %vm5_vm0, %v1280_v36, %v1279_v35  ;;  %v1281_v45 = vld [vmem:[%s2544_s0 + $0xa4] sm:$0x4]   ;;  %v426_v48 = vsel %vm13_vm2, %v1270_v39, %v422_v38 }
  0x26   :  { %319 = vrot.lane.b32.xlu0 %v318_v6, %s1513_s18  ;;  %337 = vrot.lane.b32.xlu1 %v336_v9, %s1514_s25  ;;  %s1517_s25 = smov 86   ;;  %v1283_v46 = vld [vmem:[%s2544_s0 + $0x25] sm:$0x1]   ;;  %s1518_s3 = smov 84   ;;  %v1287_v49 = vld [vmem:[%s2544_s0 + $0x24] sm:$0x1]   ;;  %v444_v51 = vsel %vm13_vm2, %v1274_v41, %v440_v40  ;;  %v458_v52 = vsel %vm9_vm1, %v1277_v43, %v454_v42  ;;  %v476_v54 = vsel %vm9_vm1, %v1281_v45, %v472_v44 }
  0x27   :  { %v1284_v47 = vld [vmem:[%s2544_s0 + $0x64] sm:$0x2]   ;;  %v1288_v50 = vld [vmem:[%s2544_s0 + $0x63] sm:$0x2]   ;;  %v1278_v53 = vld [vmem:[%s2544_s0 + $0xe4] sm:$0x8]  }
  0x28   :  { %v1282_v55 = vld [vmem:[%s2544_s0 + $0xe3] sm:$0x8]   ;;  %v490_v56 = vsel %vm5_vm0, %v1284_v47, %v1283_v46  ;;  %v1285_v57 = vld [vmem:[%s2544_s0 + $0xa3] sm:$0x4]   ;;  %v508_v58 = vsel %vm5_vm0, %v1288_v50, %v1287_v49  ;;  %v1289_v59 = vld [vmem:[%s2544_s0 + $0xa2] sm:$0x4]   ;;  %v462_v62 = vsel %vm13_vm2, %v1278_v53, %v458_v52 }
  0x29   :  { %v1291_v60 = vld [vmem:[%s2544_s0 + $0x23] sm:$0x1]   ;;  %s1520_s21 = smov 80   ;;  %v1295_v63 = vld [vmem:[%s2544_s0 + $0x22] sm:$0x1]   ;;  %v480_v1 = vsel %vm13_vm2, %v1282_v55, %v476_v54  ;;  %v494_v2 = vsel %vm9_vm1, %v1285_v57, %v490_v56  ;;  %v512_v4 = vsel %vm9_vm1, %v1289_v59, %v508_v58  ;;  %s1522_s10 = smov 76  }
  0x2a   :  { %355 = vrot.lane.b32.xlu0 %v354_v20, %s1515_s7  ;;  %373 = vrot.lane.b32.xlu1 %v372_v23, %s1516_s14  ;;  %s1519_s14 = smov 82   ;;  %v1292_v61 = vld [vmem:[%s2544_s0 + $0x62] sm:$0x2]   ;;  %v1296_v0 = vld [vmem:[%s2544_s0 + $0x61] sm:$0x2]   ;;  %s1524_s28 = smov 72  }
  0x2b   :  { %v1286_v3 = vld [vmem:[%s2544_s0 + $0xe2] sm:$0x8]   ;;  %v1290_v5 = vld [vmem:[%s2544_s0 + $0xe1] sm:$0x8]   ;;  %v526_v6 = vsel %vm5_vm0, %v1292_v61, %v1291_v60  ;;  %v1293_v7 = vld [vmem:[%s2544_s0 + $0xa1] sm:$0x4]   ;;  %v544_v8 = vsel %vm5_vm0, %v1296_v0, %v1295_v63 }
  0x2c   :  { %v1297_v9 = vld [vmem:[%s2544_s0 + $0xa0] sm:$0x4]   ;;  %v1299_v10 = vld [vmem:[%s2544_s0 + $0x21] sm:$0x1]   ;;  %v498_v12 = vsel %vm13_vm2, %v1286_v3, %v494_v2  ;;  %v1303_v13 = vld [vmem:[%s2544_s0 + $0x20] sm:$0x1]   ;;  %v516_v15 = vsel %vm13_vm2, %v1290_v5, %v512_v4  ;;  %v530_v16 = vsel %vm9_vm1, %v1293_v7, %v526_v6 }
  0x2d   :  { %v1300_v11 = vld [vmem:[%s2544_s0 + $0x60] sm:$0x2]   ;;  %v1304_v14 = vld [vmem:[%s2544_s0 + $0x5f] sm:$0x2]   ;;  %v1294_v17 = vld [vmem:[%s2544_s0 + $0xe0] sm:$0x8]   ;;  %v548_v18 = vsel %vm9_vm1, %v1297_v9, %v544_v8 }
  0x2e   :  { %391 = vrot.lane.b32.xlu0 %v390_v34, %s1517_s25  ;;  %409 = vrot.lane.b32.xlu1 %v408_v37, %s1518_s3  ;;  %s1521_s3 = smov 78   ;;  %v1298_v19 = vld [vmem:[%s2544_s0 + $0xdf] sm:$0x8]   ;;  %v562_v20 = vsel %vm5_vm0, %v1300_v11, %v1299_v10  ;;  %v1301_v21 = vld [vmem:[%s2544_s0 + $0x9f] sm:$0x4]   ;;  %v580_v22 = vsel %vm5_vm0, %v1304_v14, %v1303_v13  ;;  %v534_v26 = vsel %vm13_vm2, %v1294_v17, %v530_v16  ;;  %s1526_s17 = smov 68  }
  0x2f   :  { %v1305_v23 = vld [vmem:[%s2544_s0 + $0x9e] sm:$0x4]   ;;  %v1307_v24 = vld [vmem:[%s2544_s0 + $0x1f] sm:$0x1]   ;;  %v1311_v27 = vld [vmem:[%s2544_s0 + $0x1e] sm:$0x1]   ;;  %v552_v29 = vsel %vm13_vm2, %v1298_v19, %v548_v18  ;;  %v566_v30 = vsel %vm9_vm1, %v1301_v21, %v562_v20 }
  0x30   :  { %v1308_v25 = vld [vmem:[%s2544_s0 + $0x5e] sm:$0x2]   ;;  %v1312_v28 = vld [vmem:[%s2544_s0 + $0x5d] sm:$0x2]   ;;  %v1302_v31 = vld [vmem:[%s2544_s0 + $0xde] sm:$0x8]   ;;  %v584_v32 = vsel %vm9_vm1, %v1305_v23, %v580_v22 }
  0x31   :  { %v1306_v33 = vld [vmem:[%s2544_s0 + $0xdd] sm:$0x8]   ;;  %v598_v34 = vsel %vm5_vm0, %v1308_v25, %v1307_v24  ;;  %v1309_v35 = vld [vmem:[%s2544_s0 + $0x9d] sm:$0x4]   ;;  %v616_v36 = vsel %vm5_vm0, %v1312_v28, %v1311_v27  ;;  %v1313_v37 = vld [vmem:[%s2544_s0 + $0x9c] sm:$0x4]   ;;  %v570_v40 = vsel %vm13_vm2, %v1302_v31, %v566_v30 }
  0x32   :  { %427 = vrot.lane.b32.xlu0 %v426_v48, %s1519_s14  ;;  %445 = vrot.lane.b32.xlu1 %v444_v51, %s1520_s21  ;;  %s1523_s21 = smov 74   ;;  %v1315_v38 = vld [vmem:[%s2544_s0 + $0x1d] sm:$0x1]   ;;  %v1319_v41 = vld [vmem:[%s2544_s0 + $0x1c] sm:$0x1]   ;;  %v588_v43 = vsel %vm13_vm2, %v1306_v33, %v584_v32  ;;  %v602_v44 = vsel %vm9_vm1, %v1309_v35, %v598_v34  ;;  %v620_v46 = vsel %vm9_vm1, %v1313_v37, %v616_v36  ;;  %s1528_s6 = smov 64  }
  0x33   :  { %v1316_v39 = vld [vmem:[%s2544_s0 + $0x5c] sm:$0x2]   ;;  %v1320_v42 = vld [vmem:[%s2544_s0 + $0x5b] sm:$0x2]   ;;  %v1310_v45 = vld [vmem:[%s2544_s0 + $0xdc] sm:$0x8]  }
  0x34   :  { %v1314_v47 = vld [vmem:[%s2544_s0 + $0xdb] sm:$0x8]   ;;  %v634_v48 = vsel %vm5_vm0, %v1316_v39, %v1315_v38  ;;  %v1317_v49 = vld [vmem:[%s2544_s0 + $0x9b] sm:$0x4]   ;;  %v652_v50 = vsel %vm5_vm0, %v1320_v42, %v1319_v41  ;;  %v1321_v51 = vld [vmem:[%s2544_s0 + $0x9a] sm:$0x4]   ;;  %v606_v54 = vsel %vm13_vm2, %v1310_v45, %v602_v44 }
  0x35   :  { %v1323_v52 = vld [vmem:[%s2544_s0 + $0x1b] sm:$0x1]   ;;  %v1327_v55 = vld [vmem:[%s2544_s0 + $0x1a] sm:$0x1]   ;;  %v624_v57 = vsel %vm13_vm2, %v1314_v47, %v620_v46  ;;  %v638_v58 = vsel %vm9_vm1, %v1317_v49, %v634_v48  ;;  %v1318_v59 = vld [vmem:[%s2544_s0 + $0xda] sm:$0x8]   ;;  %v656_v60 = vsel %vm9_vm1, %v1321_v51, %v652_v50 }
  0x36   :  { %463 = vrot.lane.b32.xlu0 %v462_v62, %s1521_s3  ;;  %481 = vrot.lane.b32.xlu1 %v480_v1, %s1522_s10  ;;  %s1525_s10 = smov 70   ;;  %v1324_v53 = vld [vmem:[%s2544_s0 + $0x5a] sm:$0x2]   ;;  %v1328_v56 = vld [vmem:[%s2544_s0 + $0x59] sm:$0x2]   ;;  %s1530_s24 = smov 60   ;;  %v642_v4 = vsel %vm13_vm2, %v1318_v59, %v638_v58 }
  0x37   :  { %v1322_v61 = vld [vmem:[%s2544_s0 + $0xd9] sm:$0x8]   ;;  %v670_v62 = vsel %vm5_vm0, %v1324_v53, %v1323_v52  ;;  %v1325_v63 = vld [vmem:[%s2544_s0 + $0x99] sm:$0x4]   ;;  %v688_v0 = vsel %vm5_vm0, %v1328_v56, %v1327_v55  ;;  %v1329_v1 = vld [vmem:[%s2544_s0 + $0x98] sm:$0x4]  }
  0x38   :  { %v1331_v2 = vld [vmem:[%s2544_s0 + $0x19] sm:$0x1]   ;;  %v1335_v5 = vld [vmem:[%s2544_s0 + $0x18] sm:$0x1]   ;;  %v660_v7 = vsel %vm13_vm2, %v1322_v61, %v656_v60  ;;  %v674_v8 = vsel %vm9_vm1, %v1325_v63, %v670_v62  ;;  %v1326_v9 = vld [vmem:[%s2544_s0 + $0xd8] sm:$0x8]   ;;  %v692_v10 = vsel %vm9_vm1, %v1329_v1, %v688_v0 }
  0x39   :  { %v1332_v3 = vld [vmem:[%s2544_s0 + $0x58] sm:$0x2]   ;;  %v1336_v6 = vld [vmem:[%s2544_s0 + $0x57] sm:$0x2]   ;;  %v1330_v11 = vld [vmem:[%s2544_s0 + $0xd7] sm:$0x8]   ;;  %v678_v18 = vsel %vm13_vm2, %v1326_v9, %v674_v8 }
  0x3a   :  { %499 = vrot.lane.b32.xlu0 %v498_v12, %s1523_s21  ;;  %517 = vrot.lane.b32.xlu1 %v516_v15, %s1524_s28  ;;  %s1527_s28 = smov 66   ;;  %v706_v12 = vsel %vm5_vm0, %v1332_v3, %v1331_v2  ;;  %v1333_v13 = vld [vmem:[%s2544_s0 + $0x97] sm:$0x4]   ;;  %v724_v14 = vsel %vm5_vm0, %v1336_v6, %v1335_v5  ;;  %v1337_v15 = vld [vmem:[%s2544_s0 + $0x96] sm:$0x4]   ;;  %s1532_s13 = smov 56   ;;  %v696_v21 = vsel %vm13_vm2, %v1330_v11, %v692_v10 }
  0x3b   :  { %v1339_v16 = vld [vmem:[%s2544_s0 + $0x17] sm:$0x1]   ;;  %v1343_v19 = vld [vmem:[%s2544_s0 + $0x16] sm:$0x1]   ;;  %v710_v22 = vsel %vm9_vm1, %v1333_v13, %v706_v12  ;;  %v1334_v23 = vld [vmem:[%s2544_s0 + $0xd6] sm:$0x8]   ;;  %v728_v24 = vsel %vm9_vm1, %v1337_v15, %v724_v14 }
  0x3c   :  { %v1340_v17 = vld [vmem:[%s2544_s0 + $0x56] sm:$0x2]   ;;  %v1344_v20 = vld [vmem:[%s2544_s0 + $0x55] sm:$0x2]   ;;  %v1338_v25 = vld [vmem:[%s2544_s0 + $0xd5] sm:$0x8]   ;;  %v714_v32 = vsel %vm13_vm2, %v1334_v23, %v710_v22 }
  0x3d   :  { %v1341_v27 = vld [vmem:[%s2544_s0 + $0x95] sm:$0x4]   ;;  %v760_v28 = vsel %vm5_vm0, %v1344_v20, %v1343_v19  ;;  %v1347_v30 = vld [vmem:[%s2544_s0 + $0x15] sm:$0x1]   ;;  %s1534_s2 = smov 52   ;;  %v732_v35 = vsel %vm13_vm2, %v1338_v25, %v728_v24  ;;  %s1536_s20 = smov 48  }
  0x3e   :  { %535 = vrot.lane.b32.xlu0 %v534_v26, %s1525_s10  ;;  %553 = vrot.lane.b32.xlu1 %v552_v29, %s1526_s17  ;;  %s1529_s17 = smov 62   ;;  %v742_v26 = vsel %vm5_vm0, %v1340_v17, %v1339_v16  ;;  %v1345_v29 = vld [vmem:[%s2544_s0 + $0x94] sm:$0x4]   ;;  %v1348_v31 = vld [vmem:[%s2544_s0 + $0x54] sm:$0x2]   ;;  %s1538_s11 = smov 44  }
  0x3f   :  { %v1351_v33 = vld [vmem:[%s2544_s0 + $0x14] sm:$0x1]   ;;  %v746_v36 = vsel %vm9_vm1, %v1341_v27, %v742_v26  ;;  %v1342_v37 = vld [vmem:[%s2544_s0 + $0xd4] sm:$0x8]   ;;  %v764_v38 = vsel %vm9_vm1, %v1345_v29, %v760_v28  ;;  %v1346_v39 = vld [vmem:[%s2544_s0 + $0xd3] sm:$0x8]  }
  0x40   :  { %v1352_v34 = vld [vmem:[%s2544_s0 + $0x53] sm:$0x2]   ;;  %v1349_v41 = vld [vmem:[%s2544_s0 + $0x93] sm:$0x4]   ;;  %v1355_v44 = vld [vmem:[%s2544_s0 + $0x13] sm:$0x1]   ;;  %v750_v46 = vsel %vm13_vm2, %v1342_v37, %v746_v36  ;;  %v768_v49 = vsel %vm13_vm2, %v1346_v39, %v764_v38 }
  0x41   :  { %v796_v42 = vsel %vm5_vm0, %v1352_v34, %v1351_v33  ;;  %v1356_v45 = vld [vmem:[%s2544_s0 + $0x52] sm:$0x2]   ;;  %v1359_v47 = vld [vmem:[%s2544_s0 + $0x12] sm:$0x1]   ;;  %v1350_v51 = vld [vmem:[%s2544_s0 + $0xd2] sm:$0x8]  }
  0x42   :  { %571 = vrot.lane.b32.xlu0 %v570_v40, %s1527_s28  ;;  %589 = vrot.lane.b32.xlu1 %v588_v43, %s1528_s6  ;;  %s1531_s6 = smov 58   ;;  %v778_v40 = vsel %vm5_vm0, %v1348_v31, %v1347_v30  ;;  %v1353_v43 = vld [vmem:[%s2544_s0 + $0x92] sm:$0x4]   ;;  %v1360_v48 = vld [vmem:[%s2544_s0 + $0x51] sm:$0x2]   ;;  %s1539_s28 = smov 42  }
  0x43   :  { %v782_v50 = vsel %vm9_vm1, %v1349_v41, %v778_v40  ;;  %v800_v52 = vsel %vm9_vm1, %v1353_v43, %v796_v42  ;;  %v1354_v53 = vld [vmem:[%s2544_s0 + $0xd1] sm:$0x8]   ;;  %v1357_v55 = vld [vmem:[%s2544_s0 + $0x91] sm:$0x4]   ;;  %v1361_v58 = vld [vmem:[%s2544_s0 + $0x90] sm:$0x4]  }
  0x44   :  { %v1358_v56 = vld [vmem:[%s2544_s0 + $0xd0] sm:$0x8]   ;;  %v1363_v59 = vld [vmem:[%s2544_s0 + $0x11] sm:$0x1]   ;;  %v786_v61 = vsel %vm13_vm2, %v1350_v51, %v782_v50  ;;  %v1367_v62 = vld [vmem:[%s2544_s0 + $0x10] sm:$0x1]   ;;  %v804_v1 = vsel %vm13_vm2, %v1354_v53, %v800_v52 }
  0x45   :  { %v1364_v60 = vld [vmem:[%s2544_s0 + $0x50] sm:$0x2]   ;;  %v1368_v63 = vld [vmem:[%s2544_s0 + $0x4f] sm:$0x2]   ;;  %v1177_v0 = vld [vmem:[%s2544_s0 + $0x7e] sm:$0x4]  }
  0x46   :  { %607 = vrot.lane.b32.xlu0 %v606_v54, %s1529_s17  ;;  %625 = vrot.lane.b32.xlu1 %v624_v57, %s1530_s24  ;;  %s1533_s24 = smov 54   ;;  %v814_v54 = vsel %vm5_vm0, %v1356_v45, %v1355_v44  ;;  %v832_v57 = vsel %vm5_vm0, %v1360_v48, %v1359_v47  ;;  %v1178_v3 = vld [vmem:[%s2544_s0 + $0xbd] sm:$0x8]   ;;  %v850_v8 = vsel %vm5_vm0, %v1364_v60, %v1363_v59  ;;  %v1365_v9 = vld [vmem:[%s2544_s0 + $0x8f] sm:$0x4]   ;;  %s1541_s17 = smov 38  }
  0x47   :  { %v818_v2 = vsel %vm9_vm1, %v1357_v55, %v814_v54  ;;  %v1176_v5 = vld [vmem:[%s2544_s0 + $0x3f] sm:$0x2]   ;;  %v836_v6 = vsel %vm9_vm1, %v1361_v58, %v832_v57  ;;  %v868_v11 = vsel %vm5_vm0, %v1368_v63, %v1367_v62  ;;  %v1369_v12 = vld [vmem:[%s2544_s0 + $0x8e] sm:$0x4]   ;;  %v1371_v13 = vld [vmem:[%s2544_s0 + $0xf] sm:$0x1]  }
  0x48   :  { %v1372_v14 = vld [vmem:[%s2544_s0 + $0x4e] sm:$0x2]   ;;  %v822_v16 = vsel %vm13_vm2, %v1358_v56, %v818_v2  ;;  %v1375_v17 = vld [vmem:[%s2544_s0 + $0xe] sm:$0x1]   ;;  %v1366_v22 = vld [vmem:[%s2544_s0 + $0xce] sm:$0x8]   ;;  %v872_v23 = vsel %vm9_vm1, %v1369_v12, %v868_v11 }
  0x49   :  { %v1370_v24 = vld [vmem:[%s2544_s0 + $0xcd] sm:$0x8]   ;;  %v886_v25 = vsel %vm5_vm0, %v1372_v14, %v1371_v13  ;;  %v1373_v26 = vld [vmem:[%s2544_s0 + $0x8d] sm:$0x4]   ;;  %v1377_v28 = vld [vmem:[%s2544_s0 + $0x8c] sm:$0x4]  }
  0x4a   :  { %643 = vrot.lane.b32.xlu0 %v642_v4, %s1531_s6  ;;  %661 = vrot.lane.b32.xlu1 %v660_v7, %s1532_s13  ;;  %s1535_s13 = smov 50   ;;  %v2_v4 = vld [vmem:[%s2544_s0] sm:$0x1]   ;;  %v1362_v7 = vld [vmem:[%s2544_s0 + $0xcf] sm:$0x8]   ;;  %s1540_s6 = smov 40   ;;  %v876_v34 = vsel %vm13_vm2, %v1370_v24, %v872_v23 }
  0x4b   :  { %v6_v10 = vsel %vm5_vm0, %v1176_v5, %v2_v4  ;;  %v840_v20 = vsel %vm13_vm2, %v1362_v7, %v836_v6  ;;  %v1379_v29 = vld [vmem:[%s2544_s0 + $0xd] sm:$0x1]   ;;  %v1384_v33 = vld [vmem:[%s2544_s0 + $0x4b] sm:$0x2]   ;;  %v1374_v36 = vld [vmem:[%s2544_s0 + $0xcc] sm:$0x8]  }
  0x4c   :  { %v10_v15 = vsel %vm9_vm1, %v1177_v0, %v6_v10  ;;  %v1380_v30 = vld [vmem:[%s2544_s0 + $0x4c] sm:$0x2]   ;;  %v1378_v38 = vld [vmem:[%s2544_s0 + $0xcb] sm:$0x8]   ;;  %v1385_v42 = vld [vmem:[%s2544_s0 + $0x8a] sm:$0x4]  }
  0x4d   :  { %v14_v19 = vsel %vm13_vm2, %v1178_v3, %v10_v15  ;;  %v922_v39 = vsel %vm5_vm0, %v1380_v30, %v1379_v29  ;;  %v1381_v40 = vld [vmem:[%s2544_s0 + $0x8b] sm:$0x4]   ;;  %v1387_v43 = vld [vmem:[%s2544_s0 + $0xb] sm:$0x1]   ;;  %v1392_v47 = vld [vmem:[%s2544_s0 + $0x49] sm:$0x2]  }
  0x4e   :  { %679 = vrot.lane.b32.xlu0 %v678_v18, %s1533_s24  ;;  %697 = vrot.lane.b32.xlu1 %v696_v21, %s1534_s2  ;;  %s1537_s2 = smov 46   ;;  %v1376_v18 = vld [vmem:[%s2544_s0 + $0x4d] sm:$0x2]   ;;  %v854_v21 = vsel %vm9_vm1, %v1365_v9, %v850_v8  ;;  %16 = vst.msk [vmem:[#allocation0] ss:$8 sm:$0xf] %vm15_vm3, %v14_v19  }
  0x4f   :  { %v904_v27 = vsel %vm5_vm0, %v1376_v18, %v1375_v17  ;;  %s1542_s24 = smov 36   ;;  %v858_v31 = vsel %vm13_vm2, %v1366_v22, %v854_v21  ;;  %v1388_v44 = vld [vmem:[%s2544_s0 + $0x4a] sm:$0x2]   ;;  %v1382_v50 = vld [vmem:[%s2544_s0 + $0xca] sm:$0x8]   ;;  %s1550_s9 = smov 20  }
  0x50   :  { %v908_v37 = vsel %vm9_vm1, %v1377_v28, %v904_v27  ;;  %v1386_v52 = vld [vmem:[%s2544_s0 + $0xc9] sm:$0x8]   ;;  %v958_v53 = vsel %vm5_vm0, %v1388_v44, %v1387_v43  ;;  %v1389_v54 = vld [vmem:[%s2544_s0 + $0x89] sm:$0x4]   ;;  %v1393_v56 = vld [vmem:[%s2544_s0 + $0x88] sm:$0x4]  }
  0x51   :  { %v912_v48 = vsel %vm13_vm2, %v1378_v38, %v908_v37  ;;  %v1395_v57 = vld [vmem:[%s2544_s0 + $0x9] sm:$0x1]   ;;  %v1399_v60 = vld [vmem:[%s2544_s0 + $0x8] sm:$0x1]   ;;  %v962_v63 = vsel %vm9_vm1, %v1389_v54, %v958_v53  ;;  %v1390_v0 = vld [vmem:[%s2544_s0 + $0xc8] sm:$0x8]  }
  0x52   :  { %715 = vrot.lane.b32.xlu0 %v714_v32, %s1535_s13  ;;  %733 = vrot.lane.b32.xlu1 %v732_v35, %s1536_s20  ;;  %v1383_v32 = vld [vmem:[%s2544_s0 + $0xc] sm:$0x1]   ;;  %v890_v35 = vsel %vm9_vm1, %v1373_v26, %v886_v25  ;;  %s1544_s13 = smov 32   ;;  %v1396_v58 = vld [vmem:[%s2544_s0 + $0x48] sm:$0x2]   ;;  %s1548_s20 = smov 24   ;;  %v966_v9 = vsel %vm13_vm2, %v1390_v0, %v962_v63 }
  0x53   :  { %v940_v41 = vsel %vm5_vm0, %v1384_v33, %v1383_v32  ;;  %v894_v45 = vsel %vm13_vm2, %v1374_v36, %v890_v35  ;;  %v1394_v2 = vld [vmem:[%s2544_s0 + $0xc7] sm:$0x8]   ;;  %v994_v3 = vsel %vm5_vm0, %v1396_v58, %v1395_v57  ;;  %v1397_v4 = vld [vmem:[%s2544_s0 + $0x87] sm:$0x4]   ;;  %v1401_v6 = vld [vmem:[%s2544_s0 + $0x86] sm:$0x4]  }
  0x54   :  { %v944_v51 = vsel %vm9_vm1, %v1385_v42, %v940_v41  ;;  %v1403_v7 = vld [vmem:[%s2544_s0 + $0x7] sm:$0x1]   ;;  %v1407_v10 = vld [vmem:[%s2544_s0 + $0x6] sm:$0x1]   ;;  %v998_v13 = vsel %vm9_vm1, %v1397_v4, %v994_v3  ;;  %v1398_v14 = vld [vmem:[%s2544_s0 + $0xc6] sm:$0x8]  }
  0x55   :  { %v948_v62 = vsel %vm13_vm2, %v1386_v52, %v944_v51  ;;  %v1404_v8 = vld [vmem:[%s2544_s0 + $0x46] sm:$0x2]   ;;  %v1408_v11 = vld [vmem:[%s2544_s0 + $0x45] sm:$0x2]   ;;  %v1411_v21 = vld [vmem:[%s2544_s0 + $0x5] sm:$0x1]   ;;  %v1002_v23 = vsel %vm13_vm2, %v1398_v14, %v998_v13 }
  0x56   :  { %751 = vrot.lane.b32.xlu0 %v750_v46, %s1537_s2  ;;  %769 = vrot.lane.b32.xlu1 %v768_v49, %s1538_s11  ;;  %v1391_v46 = vld [vmem:[%s2544_s0 + $0xa] sm:$0x1]   ;;  %v926_v49 = vsel %vm9_vm1, %v1381_v40, %v922_v39  ;;  %s1546_s2 = smov 28   ;;  %v1030_v17 = vsel %vm5_vm0, %v1404_v8, %v1403_v7  ;;  %v1405_v18 = vld [vmem:[%s2544_s0 + $0x85] sm:$0x4]   ;;  %v1048_v19 = vsel %vm5_vm0, %v1408_v11, %v1407_v10  ;;  %s1552_s27 = smov 16  }
  0x57   :  { %v976_v55 = vsel %vm5_vm0, %v1392_v47, %v1391_v46  ;;  %v930_v59 = vsel %vm13_vm2, %v1382_v50, %v926_v49  ;;  %v1412_v22 = vld [vmem:[%s2544_s0 + $0x44] sm:$0x2]   ;;  %v1415_v24 = vld [vmem:[%s2544_s0 + $0x4] sm:$0x1]   ;;  %v1034_v27 = vsel %vm9_vm1, %v1405_v18, %v1030_v17  ;;  %v1406_v28 = vld [vmem:[%s2544_s0 + $0xc4] sm:$0x8]  }
  0x58   :  { %v1416_v25 = vld [vmem:[%s2544_s0 + $0x43] sm:$0x2]   ;;  %v1410_v30 = vld [vmem:[%s2544_s0 + $0xc3] sm:$0x8]   ;;  %v1413_v32 = vld [vmem:[%s2544_s0 + $0x83] sm:$0x4]   ;;  %v1038_v37 = vsel %vm13_vm2, %v1406_v28, %v1034_v27 }
  0x59   :  { %v1084_v33 = vsel %vm5_vm0, %v1416_v25, %v1415_v24  ;;  %v1419_v35 = vld [vmem:[%s2544_s0 + $0x3] sm:$0x1]   ;;  %v1423_v38 = vld [vmem:[%s2544_s0 + $0x2] sm:$0x1]   ;;  %v1414_v42 = vld [vmem:[%s2544_s0 + $0xc2] sm:$0x8]  }
  0x5a   :  { %787 = vrot.lane.b32.xlu0 %v786_v61, %s1539_s28  ;;  %805 = vrot.lane.b32.xlu1 %v804_v1, %s1540_s6  ;;  %s1543_s6 = smov 34   ;;  %v1400_v61 = vld [vmem:[%s2544_s0 + $0x47] sm:$0x2]   ;;  %v980_v1 = vsel %vm9_vm1, %v1393_v56, %v976_v55  ;;  %v1420_v36 = vld [vmem:[%s2544_s0 + $0x42] sm:$0x2]   ;;  %vm33_vm4 = vcmask 1048560  }
  0x5b   :  { %v1012_v5 = vsel %vm5_vm0, %v1400_v61, %v1399_v60  ;;  %v984_v12 = vsel %vm13_vm2, %v1394_v2, %v980_v1  ;;  %v1424_v39 = vld [vmem:[%s2544_s0 + $0x41] sm:$0x2]   ;;  %v1418_v44 = vld [vmem:[%s2544_s0 + $0xc1] sm:$0x8]   ;;  %v1421_v46 = vld [vmem:[%s2544_s0 + $0x81] sm:$0x4]  }
  0x5c   :  { %v1016_v15 = vsel %vm9_vm1, %v1401_v6, %v1012_v5  ;;  %v1120_v47 = vsel %vm5_vm0, %v1424_v39, %v1423_v38  ;;  %v1427_v49 = vld [vmem:[%s2544_s0 + $0x1] sm:$0x1]   ;;  %s1554_s16 = smov 12   ;;  %v1422_v55 = vld [vmem:[%s2544_s0 + $0xc0] sm:$0x8]   ;;  %s1555_s23 = smov 10  }
  0x5d   :  { %v1428_v50 = vld [vmem:[%s2544_s0 + $0x40] sm:$0x2]   ;;  %v1426_v58 = vld [vmem:[%s2544_s0 + $0xbf] sm:$0x8]   ;;  %vm51_vm5 = vcmask 1032160   ;;  %vm69_vm6 = vcmask 1015760  }
  0x5e   :  { %823 = vrot.lane.b32.xlu0 %v822_v16, %s1541_s17  ;;  %841 = vrot.lane.b32.xlu1 %v840_v20, %s1542_s24  ;;  %s1545_s24 = smov 30   ;;  %v1402_v16 = vld [vmem:[%s2544_s0 + $0xc5] sm:$0x8]   ;;  %v1409_v20 = vld [vmem:[%s2544_s0 + $0x84] sm:$0x4]   ;;  %vm87_vm7 = vcmask 999360  }
  0x5f   :  { %v1020_v26 = vsel %vm13_vm2, %v1402_v16, %v1016_v15  ;;  %v1052_v29 = vsel %vm9_vm1, %v1409_v20, %v1048_v19  ;;  %v1429_v60 = vld [vmem:[%s2544_s0 + $0x7f] sm:$0x4]   ;;  %vm105_vm8 = vcmask 982960   ;;  %vm123_vm9 = vcmask 966560   ;;  %s1559_s28 = smov 2  }
  0x60   :  { %v1056_v40 = vsel %vm13_vm2, %v1410_v30, %v1052_v29  ;;  %v1430_v1 = vld [vmem:[%s2544_s0 + $0xbe] sm:$0x8]   ;;  %vm141_vm10 = vcmask 950160   ;;  %vm159_vm11 = vcmask 933760   ;;  %vm177_vm12 = vcmask 917360  }
  0x61   :  { %vm195_vm13 = vcmask 900960   ;;  %vm213_vm14 = vcmask 884560   ;;  %vm231_vm15 = vcmask 868160   ;;  %vm303_vm3 = vcmask 802560  }
  0x62   :  { %859 = vrot.lane.b32.xlu0 %v858_v31, %s1543_s6  ;;  %877 = vrot.lane.b32.xlu1 %v876_v34, %s1544_s13  ;;  %s1547_s13 = smov 26   ;;  %v1066_v31 = vsel %vm5_vm0, %v1412_v22, %v1411_v21  ;;  %v1417_v34 = vld [vmem:[%s2544_s0 + $0x82] sm:$0x4]  }
  0x63   :  { %v1070_v41 = vsel %vm9_vm1, %v1413_v32, %v1066_v31  ;;  %v1088_v43 = vsel %vm9_vm1, %v1417_v34, %v1084_v33 }
  0x64   :  { %v1074_v51 = vsel %vm13_vm2, %v1414_v42, %v1070_v41  ;;  %v1092_v53 = vsel %vm13_vm2, %v1418_v44, %v1088_v43 }
  0x66   :  { %895 = vrot.lane.b32.xlu0 %v894_v45, %s1545_s24  ;;  %913 = vrot.lane.b32.xlu1 %v912_v48, %s1546_s2  ;;  %s1549_s2 = smov 22   ;;  %v1102_v45 = vsel %vm5_vm0, %v1420_v36, %v1419_v35  ;;  %v1425_v48 = vld [vmem:[%s2544_s0 + $0x80] sm:$0x4]   ;;  %s1556_s24 = smov 8  }
  0x67   :  { %v1106_v54 = vsel %vm9_vm1, %v1421_v46, %v1102_v45  ;;  %v1124_v57 = vsel %vm9_vm1, %v1425_v48, %v1120_v47  ;;  %s1557_s0 = smov 6  }
  0x68   :  { %v1110_v61 = vsel %vm13_vm2, %v1422_v55, %v1106_v54  ;;  %v1128_v63 = vsel %vm13_vm2, %v1426_v58, %v1124_v57 }
  0x6a   :  { %931 = vrot.lane.b32.xlu0 %v930_v59, %s1547_s13  ;;  %949 = vrot.lane.b32.xlu1 %v948_v62, %s1548_s20  ;;  %s1551_s20 = smov 18   ;;  %v1138_v59 = vsel %vm5_vm0, %v1428_v50, %v1427_v49  ;;  %vm249_vm0 = vcmask 851760  }
  0x6b   :  { %v1142_v0 = vsel %vm9_vm1, %v1429_v60, %v1138_v59  ;;  %vm267_vm1 = vcmask 835360  }
  0x6c   :  { %v1146_v3 = vsel %vm13_vm2, %v1430_v1, %v1142_v0  ;;  %vm285_vm2 = vcmask 818960  }
  0x6e   :  { %967 = vrot.lane.b32.xlu0 %v966_v9, %s1549_s2  ;;  %985 = vrot.lane.b32.xlu1 %v984_v12, %s1550_s9  ;;  %s1553_s9 = smov 14  }
  0x72   :  { %1003 = vrot.lane.b32.xlu0 %v1002_v23, %s1551_s20  ;;  %1021 = vrot.lane.b32.xlu1 %v1020_v26, %s1552_s27  ;;  %s1558_s27 = smov 4  }
  0x76   :  { %1039 = vrot.lane.b32.xlu0 %v1038_v37, %s1553_s9  ;;  %1057 = vrot.lane.b32.xlu1 %v1056_v40, %s1554_s16 }
  0x78   :  { %v32_v52 = vpop.permute.xlu0 %31   ;;  %v68_v56 = vpop.permute.xlu1 %67  }
  0x79   :  { %34 = vst.msk [vmem:[#allocation0] ss:$8 sm:$0xf] %vm33_vm4, %v32_v52   ;;  %vm321_vm4 = vcmask 786160  }
  0x7a   :  { %1075 = vrot.lane.b32.xlu0 %v1074_v51, %s1555_s23  ;;  %1093 = vrot.lane.b32.xlu1 %v1092_v53, %s1556_s24 }
  0x7c   :  { %v50_v62 = vpop.permute.xlu0 %49   ;;  %v86_v2 = vpop.permute.xlu1 %85  }
  0x7d   :  { %52 = vst.msk [vmem:[#allocation0] ss:$8 sm:$0xf] %vm51_vm5, %v50_v62   ;;  %vm339_vm5 = vcmask 769760  }
  0x7e   :  { %70 = vst.msk [vmem:[#allocation0] ss:$8 sm:$0xf] %vm69_vm6, %v68_v56   ;;  %1111 = vrot.lane.b32.xlu0 %v1110_v61, %s1557_s0  ;;  %1129 = vrot.lane.b32.xlu1 %v1128_v63, %s1558_s27  ;;  %vm357_vm6 = vcmask 753360  }
  0x7f   :  { %88 = vst.msk [vmem:[#allocation0] ss:$8 sm:$0xf] %vm87_vm7, %v86_v2   ;;  %vm375_vm7 = vcmask 736960  }
  0x80   :  { %v104_v4 = vpop.permute.xlu0 %103   ;;  %v122_v5 = vpop.permute.xlu1 %121  }
  0x81   :  { %106 = vst.msk [vmem:[#allocation0] ss:$8 sm:$0xf] %vm105_vm8, %v104_v4   ;;  %vm393_vm8 = vcmask 720560  }
  0x82   :  { %1147 = vrot.lane.b32.xlu0 %v1146_v3, %s1559_s28  ;;  %124 = vst.msk [vmem:[#allocation0] ss:$8 sm:$0xf] %vm123_vm9, %v122_v5   ;;  %vm411_vm9 = vcmask 704160  }
  0x84   :  { %v140_v6 = vpop.permute.xlu0 %139   ;;  %v158_v7 = vpop.permute.xlu1 %157  }
  0x85   :  { %142 = vst.msk [vmem:[#allocation0] ss:$8 sm:$0xf] %vm141_vm10, %v140_v6   ;;  %vm429_vm10 = vcmask 687760  }
  0x86   :  { %160 = vst.msk [vmem:[#allocation0] ss:$8 sm:$0xf] %vm159_vm11, %v158_v7   ;;  %vm447_vm11 = vcmask 671360  }
  0x88   :  { %v176_v8 = vpop.permute.xlu0 %175   ;;  %v194_v9 = vpop.permute.xlu1 %193  }
  0x89   :  { %178 = vst.msk [vmem:[#allocation0] ss:$8 sm:$0xf] %vm177_vm12, %v176_v8   ;;  %vm465_vm12 = vcmask 654960  }
  0x8a   :  { %196 = vst.msk [vmem:[#allocation0] ss:$8 sm:$0xf] %vm195_vm13, %v194_v9   ;;  %vm483_vm13 = vcmask 638560  }
  0x8c   :  { %v212_v10 = vpop.permute.xlu0 %211   ;;  %v230_v11 = vpop.permute.xlu1 %229  }
  0x8d   :  { %214 = vst.msk [vmem:[#allocation0] ss:$8 sm:$0xf] %vm213_vm14, %v212_v10   ;;  %vm501_vm14 = vcmask 622160  }
  0x8e   :  { %232 = vst.msk [vmem:[#allocation0] ss:$8 sm:$0xf] %vm231_vm15, %v230_v11   ;;  %vm519_vm15 = vcmask 605760  }
  0x90   :  { %v248_v12 = vpop.permute.xlu0 %247   ;;  %v266_v13 = vpop.permute.xlu1 %265  }
  0x91   :  { %250 = vst.msk [vmem:[#allocation0] ss:$8 sm:$0xf] %vm249_vm0, %v248_v12   ;;  %vm537_vm0 = vcmask 589360  }
  0x92   :  { %268 = vst.msk [vmem:[#allocation0] ss:$8 sm:$0xf] %vm267_vm1, %v266_v13   ;;  %vm555_vm1 = vcmask 572960  }
  0x94   :  { %v284_v14 = vpop.permute.xlu0 %283   ;;  %v302_v15 = vpop.permute.xlu1 %301  }
  0x95   :  { %286 = vst.msk [vmem:[#allocation0] ss:$8 sm:$0xf] %vm285_vm2, %v284_v14   ;;  %vm573_vm2 = vcmask 556560  }
  0x96   :  { %304 = vst.msk [vmem:[#allocation0] ss:$8 sm:$0xf] %vm303_vm3, %v302_v15   ;;  %vm591_vm3 = vcmask 540160  }
  0x98   :  { %v320_v16 = vpop.permute.xlu0 %319   ;;  %v338_v17 = vpop.permute.xlu1 %337  }
  0x99   :  { %322 = vst.msk [vmem:[#allocation0] ss:$8 sm:$0xf] %vm321_vm4, %v320_v16   ;;  %vm609_vm4 = vcmask 523760  }
  0x9a   :  { %340 = vst.msk [vmem:[#allocation0] ss:$8 sm:$0xf] %vm339_vm5, %v338_v17   ;;  %vm627_vm5 = vcmask 507360  }
  0x9c   :  { %v356_v18 = vpop.permute.xlu0 %355   ;;  %v374_v19 = vpop.permute.xlu1 %373  }
  0x9d   :  { %358 = vst.msk [vmem:[#allocation0] ss:$8 sm:$0xf] %vm357_vm6, %v356_v18   ;;  %vm645_vm6 = vcmask 490960  }
  0x9e   :  { %376 = vst.msk [vmem:[#allocation0] ss:$8 sm:$0xf] %vm375_vm7, %v374_v19   ;;  %vm663_vm7 = vcmask 474560  }
  0xa0   :  { %v392_v20 = vpop.permute.xlu0 %391   ;;  %v410_v21 = vpop.permute.xlu1 %409  }
  0xa1   :  { %394 = vst.msk [vmem:[#allocation0] ss:$8 sm:$0xf] %vm393_vm8, %v392_v20   ;;  %vm681_vm8 = vcmask 458160  }
  0xa2   :  { %412 = vst.msk [vmem:[#allocation0] ss:$8 sm:$0xf] %vm411_vm9, %v410_v21   ;;  %vm699_vm9 = vcmask 441760  }
  0xa4   :  { %v428_v22 = vpop.permute.xlu0 %427   ;;  %v446_v23 = vpop.permute.xlu1 %445  }
  0xa5   :  { %430 = vst.msk [vmem:[#allocation0] ss:$8 sm:$0xf] %vm429_vm10, %v428_v22   ;;  %vm717_vm10 = vcmask 425360  }
  0xa6   :  { %448 = vst.msk [vmem:[#allocation0] ss:$8 sm:$0xf] %vm447_vm11, %v446_v23   ;;  %vm735_vm11 = vcmask 408960  }
  0xa8   :  { %v464_v24 = vpop.permute.xlu0 %463   ;;  %v482_v25 = vpop.permute.xlu1 %481  }
  0xa9   :  { %466 = vst.msk [vmem:[#allocation0] ss:$8 sm:$0xf] %vm465_vm12, %v464_v24   ;;  %vm753_vm12 = vcmask 392560  }
  0xaa   :  { %484 = vst.msk [vmem:[#allocation0] ss:$8 sm:$0xf] %vm483_vm13, %v482_v25   ;;  %vm771_vm13 = vcmask 376160  }
  0xac   :  { %v500_v26 = vpop.permute.xlu0 %499   ;;  %v518_v27 = vpop.permute.xlu1 %517  }
  0xad   :  { %502 = vst.msk [vmem:[#allocation0] ss:$8 sm:$0xf] %vm501_vm14, %v500_v26   ;;  %vm789_vm14 = vcmask 359760  }
  0xae   :  { %520 = vst.msk [vmem:[#allocation0] ss:$8 sm:$0xf] %vm519_vm15, %v518_v27   ;;  %vm807_vm15 = vcmask 343360  }
  0xb0   :  { %v536_v28 = vpop.permute.xlu0 %535   ;;  %v554_v29 = vpop.permute.xlu1 %553  }
  0xb1   :  { %538 = vst.msk [vmem:[#allocation0] ss:$8 sm:$0xf] %vm537_vm0, %v536_v28   ;;  %vm825_vm0 = vcmask 326960  }
  0xb2   :  { %556 = vst.msk [vmem:[#allocation0] ss:$8 sm:$0xf] %vm555_vm1, %v554_v29   ;;  %vm843_vm1 = vcmask 310560  }
  0xb4   :  { %v572_v30 = vpop.permute.xlu0 %571   ;;  %v590_v31 = vpop.permute.xlu1 %589  }
  0xb5   :  { %574 = vst.msk [vmem:[#allocation0] ss:$8 sm:$0xf] %vm573_vm2, %v572_v30   ;;  %vm861_vm2 = vcmask 294160  }
  0xb6   :  { %592 = vst.msk [vmem:[#allocation0] ss:$8 sm:$0xf] %vm591_vm3, %v590_v31   ;;  %vm879_vm3 = vcmask 277760  }
  0xb8   :  { %v608_v32 = vpop.permute.xlu0 %607   ;;  %v626_v33 = vpop.permute.xlu1 %625  }
  0xb9   :  { %610 = vst.msk [vmem:[#allocation0] ss:$8 sm:$0xf] %vm609_vm4, %v608_v32   ;;  %vm897_vm4 = vcmask 261360  }
  0xba   :  { %628 = vst.msk [vmem:[#allocation0] ss:$8 sm:$0xf] %vm627_vm5, %v626_v33   ;;  %vm915_vm5 = vcmask 244960  }
  0xbc   :  { %v644_v34 = vpop.permute.xlu0 %643   ;;  %v662_v35 = vpop.permute.xlu1 %661  }
  0xbd   :  { %646 = vst.msk [vmem:[#allocation0] ss:$8 sm:$0xf] %vm645_vm6, %v644_v34   ;;  %vm933_vm6 = vcmask 228560  }
  0xbe   :  { %664 = vst.msk [vmem:[#allocation0] ss:$8 sm:$0xf] %vm663_vm7, %v662_v35   ;;  %vm951_vm7 = vcmask 212160  }
  0xc0   :  { %v680_v36 = vpop.permute.xlu0 %679   ;;  %v698_v37 = vpop.permute.xlu1 %697  }
  0xc1   :  { %682 = vst.msk [vmem:[#allocation0] ss:$8 sm:$0xf] %vm681_vm8, %v680_v36   ;;  %vm969_vm8 = vcmask 195760  }
  0xc2   :  { %700 = vst.msk [vmem:[#allocation0] ss:$8 sm:$0xf] %vm699_vm9, %v698_v37   ;;  %vm987_vm9 = vcmask 179360  }
  0xc4   :  { %v716_v38 = vpop.permute.xlu0 %715   ;;  %v734_v39 = vpop.permute.xlu1 %733  }
  0xc5   :  { %718 = vst.msk [vmem:[#allocation0] ss:$8 sm:$0xf] %vm717_vm10, %v716_v38   ;;  %vm1005_vm10 = vcmask 162960  }
  0xc6   :  { %736 = vst.msk [vmem:[#allocation0] ss:$8 sm:$0xf] %vm735_vm11, %v734_v39   ;;  %vm1023_vm11 = vcmask 146560  }
  0xc8   :  { %v752_v40 = vpop.permute.xlu0 %751   ;;  %v770_v41 = vpop.permute.xlu1 %769  }
  0xc9   :  { %754 = vst.msk [vmem:[#allocation0] ss:$8 sm:$0xf] %vm753_vm12, %v752_v40   ;;  %vm1041_vm12 = vcmask 130160  }
  0xca   :  { %772 = vst.msk [vmem:[#allocation0] ss:$8 sm:$0xf] %vm771_vm13, %v770_v41   ;;  %vm1059_vm13 = vcmask 113760  }
  0xcc   :  { %v788_v42 = vpop.permute.xlu0 %787   ;;  %v806_v43 = vpop.permute.xlu1 %805  }
  0xcd   :  { %790 = vst.msk [vmem:[#allocation0] ss:$8 sm:$0xf] %vm789_vm14, %v788_v42   ;;  %vm1077_vm14 = vcmask 97360  }
  0xce   :  { %808 = vst.msk [vmem:[#allocation0] ss:$8 sm:$0xf] %vm807_vm15, %v806_v43   ;;  %vm1095_vm15 = vcmask 80960  }
  0xd0   :  { %v824_v44 = vpop.permute.xlu0 %823   ;;  %v842_v45 = vpop.permute.xlu1 %841  }
  0xd1   :  { %826 = vst.msk [vmem:[#allocation0] ss:$8 sm:$0xf] %vm825_vm0, %v824_v44   ;;  %vm1113_vm0 = vcmask 64560  }
  0xd2   :  { %844 = vst.msk [vmem:[#allocation0] ss:$8 sm:$0xf] %vm843_vm1, %v842_v45   ;;  %vm1131_vm1 = vcmask 48160  }
  0xd4   :  { %v860_v46 = vpop.permute.xlu0 %859   ;;  %v878_v47 = vpop.permute.xlu1 %877  }
  0xd5   :  { %862 = vst.msk [vmem:[#allocation0] ss:$8 sm:$0xf] %vm861_vm2, %v860_v46   ;;  %vm1149_vm2 = vcmask 31760  }
  0xd6   :  { %880 = vst.msk [vmem:[#allocation0] ss:$8 sm:$0xf] %vm879_vm3, %v878_v47  }
  0xd8   :  { %v896_v48 = vpop.permute.xlu0 %895   ;;  %v914_v49 = vpop.permute.xlu1 %913  }
  0xd9   :  { %898 = vst.msk [vmem:[#allocation0] ss:$8 sm:$0xf] %vm897_vm4, %v896_v48  }
  0xda   :  { %916 = vst.msk [vmem:[#allocation0] ss:$8 sm:$0xf] %vm915_vm5, %v914_v49  }
  0xdc   :  { %v932_v50 = vpop.permute.xlu0 %931   ;;  %v950_v51 = vpop.permute.xlu1 %949  }
  0xdd   :  { %934 = vst.msk [vmem:[#allocation0] ss:$8 sm:$0xf] %vm933_vm6, %v932_v50  }
  0xde   :  { %952 = vst.msk [vmem:[#allocation0] ss:$8 sm:$0xf] %vm951_vm7, %v950_v51  }
  0xe0   :  { %v968_v52 = vpop.permute.xlu0 %967   ;;  %v986_v53 = vpop.permute.xlu1 %985  }
  0xe1   :  { %970 = vst.msk [vmem:[#allocation0] ss:$8 sm:$0xf] %vm969_vm8, %v968_v52  }
  0xe2   :  { %988 = vst.msk [vmem:[#allocation0] ss:$8 sm:$0xf] %vm987_vm9, %v986_v53  }
  0xe4   :  { %v1004_v54 = vpop.permute.xlu0 %1003   ;;  %v1022_v55 = vpop.permute.xlu1 %1021  }
  0xe5   :  { %1006 = vst.msk [vmem:[#allocation0] ss:$8 sm:$0xf] %vm1005_vm10, %v1004_v54  }
  0xe6   :  { %1024 = vst.msk [vmem:[#allocation0] ss:$8 sm:$0xf] %vm1023_vm11, %v1022_v55  }
  0xe8   :  { %v1040_v56 = vpop.permute.xlu0 %1039   ;;  %v1058_v57 = vpop.permute.xlu1 %1057  }
  0xe9   :  { %1042 = vst.msk [vmem:[#allocation0] ss:$8 sm:$0xf] %vm1041_vm12, %v1040_v56  }
  0xea   :  { %1060 = vst.msk [vmem:[#allocation0] ss:$8 sm:$0xf] %vm1059_vm13, %v1058_v57  }
  0xec   :  { %v1076_v58 = vpop.permute.xlu0 %1075   ;;  %v1094_v59 = vpop.permute.xlu1 %1093  }
  0xed   :  { %1078 = vst.msk [vmem:[#allocation0] ss:$8 sm:$0xf] %vm1077_vm14, %v1076_v58  }
  0xee   :  { %1096 = vst.msk [vmem:[#allocation0] ss:$8 sm:$0xf] %vm1095_vm15, %v1094_v59  }
  0xf0   :  { %v1112_v60 = vpop.permute.xlu0 %1111   ;;  %v1130_v61 = vpop.permute.xlu1 %1129  }
  0xf1   :  { %1114 = vst.msk [vmem:[#allocation0] ss:$8 sm:$0xf] %vm1113_vm0, %v1112_v60  }
  0xf2   :  { %1132 = vst.msk [vmem:[#allocation0] ss:$8 sm:$0xf] %vm1131_vm1, %v1130_v61  }
  0xf4   :  { %v1148_v62 = vpop.permute.xlu0 %1147  }
  0xf5   :  { %1150 = vst.msk [vmem:[#allocation0] ss:$8 sm:$0xf] %vm1149_vm2, %v1148_v62  }
  0xfc   :  { %v1154_v63 = vld [vmem:[#allocation0] sm:$0x1]  ;;  %v1158_v0 = vld [vmem:[#allocation0 + $0x8] sm:$0x1]  ;;  %v1163_v1 = vld [vmem:[#allocation0 + $0x10] sm:$0x1] }
  0xfd   :  { %1156 = vst [vmem:[%s2545_s1] sm:$0x1] %v1154_v63  ;;  %1431 = vst [vmem:[%s2545_s1 + $0x1] sm:$0x1] %v1158_v0  ;;  %v1169_v2 = vld [vmem:[#allocation0 + $0x18] sm:$0x1] }
  0xfe   :  { %1432 = vst [vmem:[%s2545_s1 + $0x2] sm:$0x1] %v1163_v1  ;;  %1433 = vst [vmem:[%s2545_s1 + $0x3] sm:$0x1] %v1169_v2 }

// kernel: squeeze.4
= control target key start
LH: loop header
LB: loop body
LE: loop exit
PB: predicated region body
PF: predicated region fallthrough
CT: control target
= control target key end

     0   :  { %vm7_vm0 = vcmask 31744   ;;  %s39_s0 = inlined_call_operand.vmem [shape: f32[8], index: 0, kind: input, shape index: {}]   ;;  %s40_s1 = inlined_call_operand.vmem [shape: f32[2,4], index: 1, kind: output, shape index: {}]  }
   0x1   :  { %v4_v0 = vld [vmem:[%s39_s0] sm:$0x1]  ;;  %s22_s0 = smov 124  }
   0x2   :  { %5 = vst [vmem:[#allocation1] sm:$0x1] %v4_v0 }
   0x9   :  { %v9_v1 = vld [vmem:[#allocation1] sm:$0x1]  }
   0xa   :  { %v6_v2 = vld [vmem:[#allocation1] sm:$0x1]   ;;  %10 = vrot.lane.b32.xlu0 %v9_v1, %s22_s0 }
   0xb   :  { %8 = vst.msk [vmem:[#allocation0] sm:$0x1] %vm7_vm0, %v6_v2  }
  0x7c   :  { %v11_v3 = vpop.permute.xlu0 %10  }
  0x7d   :  { %14 = vst.msk [vmem:[#allocation0 + $0x1] sm:$0x1] %vm7_vm0, %v11_v3  }
  0x84   :  { %v18_v4 = vld [vmem:[#allocation0] sm:$0x3] }
  0x85   :  { %20 = vst [vmem:[%s40_s1] sm:$0x3] %v18_v4 }

// kernel: cbatchnorm2d.2
= control target key start
LH: loop header
LB: loop body
LE: loop exit
PB: predicated region body
PF: predicated region fallthrough
CT: control target
= control target key end

     0   :  { %v52_v0 = vlaneseq  ;;  %vm41_vm0 = vcmask 7168   ;;  %v140_v4 = vmov 0.0   ;;  %s230_s0 = inlined_call_operand.vmem [shape: f32[8,512], index: 0, kind: input, shape index: {}]   ;;  %s231_s1 = inlined_call_operand.vmem [shape: f32[1,512], index: 1, kind: input, shape index: {}]   ;;  %s232_s4 = inlined_call_operand.vmem [shape: f32[1,8,1], index: 4, kind: output, shape index: {2}]   ;;  %s233_s2 = inlined_call_operand.vmem [shape: f32[1,8,1], index: 2, kind: output, shape index: {0}]   ;;  %s234_s5 = inlined_call_operand.vmem [shape: f32[1,8,1], index: 5, kind: output, shape index: {3}]   ;;  %s235_s3 = inlined_call_operand.vmem [shape: f32[1,8,1], index: 3, kind: output, shape index: {1}]  }
   0x1   :  { %v46_v1 = vld [vmem:[%s230_s0] sm:$0xff]  ;;  %v47_v2 = vld [vmem:[%s230_s0 + $0x8] sm:$0xff]  ;;  %v48_v3 = vld [vmem:[%s230_s0 + $0x10] sm:$0xff]  ;;  %44 = vst.msk [vmem:[%s232_s4] sm:$0xff] %vm41_vm0, %v140_v4 }
   0x2   :  { %v49_v5 = vld [vmem:[%s230_s0 + $0x18] sm:$0xff]  ;;  %v53_v6 = vshrl.u32 %v52_v0, 7  ;;  %v50_v7 = vld [vmem:[%s231_s1] sm:$0xf]  ;;  %v76_v8 = vmul.f32 %v46_v1, %v46_v1  ;;  %v77_v9 = vmul.f32 %v47_v2, %v47_v2  ;;  %v78_v10 = vmul.f32 %v48_v3, %v48_v3  ;;  %42 = vst.msk [vmem:[%s233_s2] sm:$0xff] %vm41_vm0, %v140_v4  ;;  %45 = vst.msk [vmem:[%s234_s5] sm:$0xff] %vm41_vm0, %v140_v4 }
   0x3   :  { %v79_v15 = vmul.f32 %v49_v5, %v49_v5  ;;  %v94_v27 = vadd.f32 %v47_v2, %v46_v1  ;;  %43 = vst.msk [vmem:[%s235_s3] sm:$0xff] %vm41_vm0, %v140_v4 }
   0x4   :  { %v54_v11 = vsub.s32 0, %v53_v6  ;;  %v58_v12 = vsub.s32 1, %v53_v6  ;;  %v62_v13 = vsub.s32 2, %v53_v6  ;;  %v66_v14 = vsub.s32 3, %v53_v6 }
   0x5   :  { %v110_v23 = vadd.f32 %v77_v9, %v76_v8  ;;  %v95_v35 = vadd.f32 %v94_v27, %v48_v3 }
   0x6   :  { %v55_v16 = vrot.slane %v50_v7, %v54_v11  ;;  %v59_v17 = vrot.slane %v50_v7, %v58_v12  ;;  %v63_v18 = vrot.slane %v50_v7, %v62_v13  ;;  %v67_v19 = vrot.slane %v50_v7, %v66_v14 }
   0x7   :  { %v111_v33 = vadd.f32 %v110_v23, %v78_v10  ;;  %v96_v39 = vadd.f32 %v95_v35, %v49_v5 }
   0x8   :  { %v80_v20 = vmul.f32 %v76_v8, %v55_v16  ;;  %v81_v21 = vmul.f32 %v77_v9, %v59_v17  ;;  %v82_v22 = vmul.f32 %v78_v10, %v63_v18  ;;  %v72_v24 = vmul.f32 %v55_v16, %v46_v1  ;;  %v101_v40 = vld [vmem:[%s232_s4] sm:$0xff] }
   0x9   :  { %v73_v25 = vmul.f32 %v59_v17, %v47_v2  ;;  %v74_v26 = vmul.f32 %v63_v18, %v48_v3  ;;  %v83_v28 = vmul.f32 %v79_v15, %v67_v19  ;;  %v75_v30 = vmul.f32 %v67_v19, %v49_v5  ;;  %v84_v41 = vld [vmem:[%s233_s2] sm:$0xff] }
   0xa   :  { %v102_v29 = vadd.f32 %v81_v21, %v80_v20  ;;  %v112_v38 = vadd.f32 %v111_v33, %v79_v15  ;;  %v109_v46 = vld [vmem:[%s234_s5] sm:$0xff] }
   0xb   :  { %v85_v31 = vadd.f32 %v73_v25, %v72_v24  ;;  %v93_v47 = vld [vmem:[%s235_s3] sm:$0xff] }
   0xc   :  { %v103_v32 = vadd.f32 %v102_v29, %v82_v22 }
   0xd   :  { %v86_v34 = vadd.f32 %v85_v31, %v74_v26 }
   0xe   :  { %v104_v36 = vadd.f32 %v103_v32, %v83_v28 }
   0xf   :  { %v87_v37 = vadd.f32 %v86_v34, %v75_v30 }
  0x10   :  { %105 = vadd.xlane.f32.xlu1 %v104_v36 }
  0x11   :  { %88 = vadd.xlane.f32.xlu0 %v87_v37 }
  0x14   :  { %113 = vadd.xlane.f32.xlu1 %v112_v38 }
  0x15   :  { %97 = vadd.xlane.f32.xlu0 %v96_v39 }
  0x9d   :  { %v106_v42 = vpop.xlane.xlu1 %105 }
  0x9e   :  { %v107_v43 = vadd.f32 %v106_v42, %v101_v40  ;;  %v89_v44 = vpop.xlane.xlu0 %88 }
  0x9f   :  { %v90_v45 = vadd.f32 %v89_v44, %v84_v41 }
  0xa0   :  { %108 = vst.msk [vmem:[%s232_s4] sm:$0xff] %vm41_vm0, %v107_v43 }
  0xa1   :  { %92 = vst.msk [vmem:[%s233_s2] sm:$0xff] %vm41_vm0, %v90_v45  ;;  %v114_v48 = vpop.xlane.xlu1 %113 }
  0xa2   :  { %v115_v49 = vadd.f32 %v114_v48, %v109_v46  ;;  %v98_v50 = vpop.xlane.xlu0 %97 }
  0xa3   :  { %v99_v51 = vadd.f32 %v98_v50, %v93_v47 }
  0xa4   :  { %116 = vst.msk [vmem:[%s234_s5] sm:$0xff] %vm41_vm0, %v115_v49 }
  0xa5   :  { %100 = vst.msk [vmem:[%s235_s3] sm:$0xff] %vm41_vm0, %v99_v51 }

// kernel: cbatchnorm2d.3
= control target key start
LH: loop header
LB: loop body
LE: loop exit
PB: predicated region body
PF: predicated region fallthrough
CT: control target
= control target key end

     0   :  { %v97_v0 = vmov 0   ;;  %v98_v3 = vmov 1   ;;  %v23_v4 = vlaneseq  ;;  %s165_s3 = inlined_call_operand.vmem [shape: f32[8,2], index: 3, kind: input, shape index: {}]   ;;  %s166_s2 = inlined_call_operand.vmem [shape: f32[8,2], index: 2, kind: input, shape index: {}]   ;;  %s167_s1 = inlined_call_operand.vmem [shape: f32[1,512], index: 1, kind: input, shape index: {}]   ;;  %s168_s0 = inlined_call_operand.vmem [shape: f32[8,512], index: 0, kind: input, shape index: {}]   ;;  %s169_s4 = inlined_call_operand.vmem [shape: f32[8,512], index: 4, kind: output, shape index: {}]  }
   0x1   :  { %95 = vset.pattern.permute.xlu1 %v97_v0  ;;  %93 = vset.pattern.permute.xlu0 %v97_v0  ;;  %v61_v1 = vld [vmem:[%s165_s3] sm:$0xff]  ;;  %v18_v19 = vld [vmem:[%s168_s0 + $0x8] sm:$0xff]  ;;  %v19_v20 = vld [vmem:[%s168_s0 + $0x10] sm:$0xff] }
   0x2   :  { %v47_v2 = vld [vmem:[%s166_s2] sm:$0xff]  ;;  %64 = vperm.xlu1 %95, %v61_v1   ;;  %v24_v5 = vshrl.u32 %v23_v4, 7  ;;  %v20_v21 = vld [vmem:[%s168_s0 + $0x18] sm:$0xff] }
   0x3   :  { %50 = vperm.xlu0 %93, %v47_v2   ;;  %v21_v10 = vld [vmem:[%s167_s1] sm:$0xf] }
   0x4   :  { %v25_v6 = vsub.s32 0, %v24_v5  ;;  %v29_v7 = vsub.s32 1, %v24_v5  ;;  %v33_v8 = vsub.s32 2, %v24_v5  ;;  %v37_v9 = vsub.s32 3, %v24_v5  ;;  %v17_v17 = vld [vmem:[%s168_s0] sm:$0xff] }
   0x6   :  { %96 = vset.pattern.permute.xlu1 %v98_v3  ;;  %v26_v13 = vrot.slane %v21_v10, %v25_v6  ;;  %v30_v14 = vrot.slane %v21_v10, %v29_v7  ;;  %v34_v15 = vrot.slane %v21_v10, %v33_v8  ;;  %v38_v16 = vrot.slane %v21_v10, %v37_v9 }
   0x7   :  { %94 = vset.pattern.permute.xlu0 %v98_v3  ;;  %68 = vperm.xlu1 %96, %v61_v1  }
   0x8   :  { %54 = vperm.xlu0 %94, %v47_v2   ;;  %vm43_vm0 = vcmp.gt.f32.partialorder %v26_v13, 0.5  ;;  %vm44_vm1 = vcmp.gt.f32.partialorder %v30_v14, 0.5  ;;  %vm45_vm2 = vcmp.gt.f32.partialorder %v34_v15, 0.5  ;;  %vm46_vm3 = vcmp.gt.f32.partialorder %v38_v16, 0.5 }
  0x81   :  { %v65_v12 = vpop.permute.xlu1 %64 }
  0x82   :  { %v51_v11 = vpop.permute.xlu0 %50 }
  0x86   :  { %v69_v22 = vpop.permute.xlu1 %68 }
  0x87   :  { %v55_v18 = vpop.permute.xlu0 %54  ;;  %v71_v31 = vsel %vm43_vm0, %v65_v12, %v69_v22  ;;  %v72_v32 = vsel %vm44_vm1, %v65_v12, %v69_v22  ;;  %v73_v33 = vsel %vm45_vm2, %v65_v12, %v69_v22  ;;  %v74_v34 = vsel %vm46_vm3, %v65_v12, %v69_v22 }
  0x88   :  { %v57_v23 = vsel %vm43_vm0, %v51_v11, %v55_v18  ;;  %v58_v24 = vsel %vm44_vm1, %v51_v11, %v55_v18  ;;  %v59_v25 = vsel %vm45_vm2, %v51_v11, %v55_v18  ;;  %v60_v26 = vsel %vm46_vm3, %v51_v11, %v55_v18 }
  0x89   :  { %v75_v27 = vmul.f32 %v57_v23, %v17_v17  ;;  %v76_v28 = vmul.f32 %v58_v24, %v18_v19  ;;  %v77_v29 = vmul.f32 %v59_v25, %v19_v20  ;;  %v78_v30 = vmul.f32 %v60_v26, %v20_v21 }
  0x8b   :  { %v79_v35 = vadd.f32 %v75_v27, %v71_v31  ;;  %v80_v36 = vadd.f32 %v76_v28, %v72_v32  ;;  %v81_v37 = vadd.f32 %v77_v29, %v73_v33  ;;  %v82_v38 = vadd.f32 %v78_v30, %v74_v34 }
  0x8d   :  { %83 = vst [vmem:[%s169_s4] sm:$0xff] %v79_v35  ;;  %84 = vst [vmem:[%s169_s4 + $0x8] sm:$0xff] %v80_v36 }
  0x8e   :  { %85 = vst [vmem:[%s169_s4 + $0x10] sm:$0xff] %v81_v37  ;;  %86 = vst [vmem:[%s169_s4 + $0x18] sm:$0xff] %v82_v38 }

</bundles_post_ra>
